<compile_context>
chip_gen: v7x
topology: tpu7x:2x2x1
jax: 0.10.0
libtpu: 0.0.40
codegen_flags: <defaults>
</compile_context>

<pallas_src>
import jax
import jax.numpy as jnp
import numpy as np
from jax import lax
from jax.experimental import pallas as pl
from jax.experimental.pallas import tpu as pltpu


def _round_up(x, m):
    return ((x + m - 1) // m) * m


def lstm_chunk_kernel(gx_ref, h0_ref, c0_ref, whh_ref, wout_ref,
                      y_ref, hn_ref, cn_ref,
                      h_scr, c_scr, hseq_scr):
    """One grid step = T_CHUNK timesteps of the recurrence for one batch shard."""
    t_step = pl.program_id(1)
    t_chunk = gx_ref.shape[0]
    Hp = h_scr.shape[-1]

    # (Re-)initialize the carried state from (h0, c0) at the start of each batch shard's
    # time loop (time is the innermost / fastest grid axis).
    @pl.when(t_step == 0)
    def _():
        h_scr[...] = h0_ref[...]
        c_scr[...] = c0_ref[...]

    h = h_scr[...]                    # (Bs, Hp) f32 carried state
    c = c_scr[...]
    whh = whh_ref[...]                # (Hp, 4Hp) bf16, VMEM-resident across all grid steps

    def step(t, h, c):
        # Only matmul on the serial critical path: bf16 x bf16 -> f32 accumulate on the MXU.
        gates = gx_ref[t].astype(jnp.float32) + jnp.dot(
            h.astype(jnp.bfloat16), whh, preferred_element_type=jnp.float32)
        # Lane-aligned gate slices (Hp is a multiple of 128).
        i_g = jax.nn.sigmoid(gates[:, 0 * Hp:1 * Hp])
        f_g = jax.nn.sigmoid(gates[:, 1 * Hp:2 * Hp])
        g_g = jnp.tanh(gates[:, 2 * Hp:3 * Hp])
        o_g = jax.nn.sigmoid(gates[:, 3 * Hp:4 * Hp])
        c = f_g * c + i_g * g_g
        h = o_g * jnp.tanh(c)
        hseq_scr[t] = h               # VMEM scratch only; never written to HBM
        return h, c

    if t_chunk <= 16:
        # Small chunk: full static unroll (max LLO scheduler visibility).
        for t in range(t_chunk):
            h, c = step(t, h, c)
    else:
        # Large chunk: modest unroll keeps vreg live ranges / code size bounded.
        def body(t, carry):
            return step(t, *carry)
        h, c = lax.fori_loop(0, t_chunk, body, (h, c), unroll=4)

    h_scr[...] = h
    c_scr[...] = c

    # Fused Linear(H, 1) head over the whole chunk: elementwise mul + lane reduce (VPU/XLU),
    # done once per chunk so it stays off the per-step serial chain.
    w = wout_ref[...]                                             # (1, Hp) f32
    y = jnp.sum(hseq_scr[...] * w[None, :, :], axis=-1)           # (t_chunk, Bs) f32
    y_ref[0] = y

    # Final hidden/cell state for this batch shard, written on the last time chunk
    # (resident output blocks along the "arbitrary" time axis).
    @pl.when(t_step == pl.num_programs(1) - 1)
    def _():
        hn_ref[...] = h
        cn_ref[...] = c


def _pad_lstm_params(w_ih, w_hh, b_ih, b_hh, w_out, H, Hp):
    """Zero-pad the hidden dim H -> Hp inside each gate block (i, f, g, o).

    Zero padding keeps the padded h/c lanes exactly 0 for all timesteps: padded gate
    pre-activations are 0 => (i, f, o) = 0.5, g = tanh(0) = 0 => c_pad stays 0 and
    h_pad = 0.5 * tanh(0) = 0, and padded W_hh columns are 0 so they never feed back.
    """
    pad = Hp - H
    I = w_ih.shape[1]
    w_ih_p = jnp.pad(w_ih.reshape(4, H, I), ((0, 0), (0, pad), (0, 0))).reshape(4 * Hp, I)
    w_hh_p = jnp.pad(w_hh.reshape(4, H, H), ((0, 0), (0, pad), (0, pad))).reshape(4 * Hp, Hp)
    bias_p = jnp.pad((b_ih + b_hh).reshape(4, H), ((0, 0), (0, pad))).reshape(4 * Hp)
    w_out_p = jnp.pad(w_out, ((0, 0), (0, pad)))                  # (1, Hp)
    return w_ih_p, w_hh_p, bias_p, w_out_p


def _vmem_estimate(t_chunk, B_pad, Hp):
    gx = 2 * t_chunk * B_pad * 4 * Hp * 2        # double-buffered bf16 gates_x chunk
    yout = 2 * t_chunk * B_pad * 4               # double-buffered f32 head output chunk
    hseq = t_chunk * B_pad * Hp * 4              # per-chunk hidden scratch
    whh = Hp * 4 * Hp * 2                        # resident W_hh^T (bf16)
    state = 6 * B_pad * Hp * 4                   # h/c scratch + h0/c0/h_n/c_n blocks
    return gx + yout + hseq + whh + state


def _pick_t_chunk(T, B_pad, Hp, budget_bytes):
    # Legal chunks: divide T and keep the (1, t_chunk, B_shard) output block's second-to-last
    # dim either full (== T) or a multiple of 8 (sublane rule).
    candidates = [tc for tc in range(T, 0, -1)
                  if T % tc == 0 and (tc == T or tc % 8 == 0)]
    for tc in candidates:
        if _vmem_estimate(tc, B_pad, Hp) <= budget_bytes:
            return tc
    return candidates[-1]   # nothing fits the budget; wrapper raises vmem_limit_bytes


def lstm_forward(x, h_state, params, *, t_chunk=None, num_batch_shards=1,
                 gates_buffering=None, vmem_budget_bytes=24 * 1024 * 1024):
    """Forward pass equivalent to the PyTorch module.

    x: [B, T, I] (batch_first); h_state = (h0, c0), each [1, B, H].
    Returns (out [B, T, 1], (h_n [1, B, H], c_n [1, B, H])).

    num_batch_shards: set to 2 on v7x (2 TensorCores) when B_pad/2 is still a multiple of 8;
      each shard runs an independent recurrence with its own h/c scratch.
    gates_buffering: e.g. 3 on v5e if chunk-boundary gates_x DMA shows up as exposed.
    vmem_budget_bytes: budget used to size t_chunk; lower on v7x (64 MiB physical VMEM),
      raise on v6e/v5e (128 MiB) for long sequences.
    """
    w_ih, w_hh, b_ih, b_hh, w_out, b_out = params
    B, T, I = x.shape
    H = w_hh.shape[1]
    h0, c0 = h_state

    # Pad batch to the f32 sublane count and hidden to the lane count: full vregs for the
    # activation chain and lane-aligned gate slices inside the kernel.
    B_pad = _round_up(B, 8)
    Hp = _round_up(H, 128)
    w_ih_p, w_hh_p, bias_p, w_out_p = _pad_lstm_params(w_ih, w_hh, b_ih, b_hh, w_out, H, Hp)

    assert B_pad % num_batch_shards == 0, "num_batch_shards must divide padded batch"
    B_shard = B_pad // num_batch_shards
    assert B_shard % 8 == 0, "each batch shard must keep full sublanes (multiple of 8)"

    if t_chunk is None:
        t_chunk = _pick_t_chunk(T, B_pad, Hp, vmem_budget_bytes)
    assert T % t_chunk == 0, "T must be divisible by t_chunk"

    # Hoisted input projection: one (T*B, I) @ (I, 4Hp) matmul on time-major x with the
    # combined bias folded in; streamed to the kernel as bf16 time-major [T, B_pad, 4Hp].
    x_p = jnp.pad(x, ((0, B_pad - B), (0, 0), (0, 0)))
    x_tm = jnp.transpose(x_p, (1, 0, 2)).reshape(T * B_pad, I)
    gates_x = (x_tm @ w_ih_p.T + bias_p).astype(jnp.bfloat16).reshape(T, B_pad, 4 * Hp)

    whh_t = w_hh_p.T.astype(jnp.bfloat16)                         # (Hp, 4Hp) bf16, resident
    h0_p = jnp.pad(h0[0], ((0, B_pad - B), (0, Hp - H))).astype(jnp.float32)
    c0_p = jnp.pad(c0[0], ((0, B_pad - B), (0, Hp - H))).astype(jnp.float32)
    w_out_row = w_out_p.astype(jnp.float32)                       # (1, Hp)

    grid = (num_batch_shards, T // t_chunk)

    # Only raise the scoped-VMEM limit when the chosen chunk actually needs it.
    vmem_est = _vmem_estimate(t_chunk, B_pad, Hp)
    vmem_limit = int(vmem_est * 1.25) if vmem_est > 32 * 1024 * 1024 else None

    gx_kwargs = {}
    if gates_buffering is not None:
        gx_kwargs["pipeline_mode"] = pl.Buffered(gates_buffering)

    y, h_n_p, c_n_p = pl.pallas_call(
        lstm_chunk_kernel,
        out_shape=(
            # Head output keeps B_shard as the full last dim so the BlockSpec stays legal
            # for any shard count; the slab is tiny (T*B f32) since the head is fused.
            jax.ShapeDtypeStruct((num_batch_shards, T, B_shard), jnp.float32),
            jax.ShapeDtypeStruct((B_pad, Hp), jnp.float32),       # h_n
            jax.ShapeDtypeStruct((B_pad, Hp), jnp.float32),       # c_n
        ),
        grid=grid,
        in_specs=[
            pl.BlockSpec((t_chunk, B_shard, 4 * Hp), lambda b, i: (i, b, 0), **gx_kwargs),
            pl.BlockSpec((B_shard, Hp), lambda b, i: (b, 0)),     # h0
            pl.BlockSpec((B_shard, Hp), lambda b, i: (b, 0)),     # c0
            pl.BlockSpec((Hp, 4 * Hp), lambda b, i: (0, 0)),      # W_hh^T (resident)
            pl.BlockSpec((1, Hp), lambda b, i: (0, 0)),           # w_out (resident)
        ],
        out_specs=(
            pl.BlockSpec((1, t_chunk, B_shard), lambda b, i: (b, i, 0)),   # head chunk
            pl.BlockSpec((B_shard, Hp), lambda b, i: (b, 0)),              # h_n (resident)
            pl.BlockSpec((B_shard, Hp), lambda b, i: (b, 0)),              # c_n (resident)
        ),
        scratch_shapes=[
            pltpu.VMEM((B_shard, Hp), jnp.float32),               # carried h
            pltpu.VMEM((B_shard, Hp), jnp.float32),               # carried c
            pltpu.VMEM((t_chunk, B_shard, Hp), jnp.float32),      # per-chunk hidden states
        ],
        # Batch shards are independent ("parallel" -> 2 TCs on v7x); the time axis carries
        # h/c state in scratch -> must stay "arbitrary" and innermost.
        compiler_params=pltpu.CompilerParams(
            dimension_semantics=("parallel", "arbitrary"),
            vmem_limit_bytes=vmem_limit),
    )(gates_x, h0_p, c0_p, whh_t, w_out_row)

    # Reassemble: y[s, t, j] -> (T, B_pad) with b_global = s * B_shard + j.
    y_tb = jnp.transpose(y, (1, 0, 2)).reshape(T, B_pad)
    out = jnp.transpose(y_tb[:, :B])[:, :, None] + b_out          # [B, T, 1]
    h_n = h_n_p[:B, :H][None]
    c_n = c_n_p[:B, :H][None]
    return out, (h_n, c_n)


def lstm_reference(x, h_state, params):
    """Pure-JAX reference (mirrors torch.nn.LSTM + nn.Linear semantics)."""
    w_ih, w_hh, b_ih, b_hh, w_out, b_out = params
    h, c = h_state[0][0], h_state[1][0]
    H = w_hh.shape[1]
    outs = []
    for t in range(x.shape[1]):
        x_t = x[:, t, :]
        gates = x_t @ w_ih.T + b_ih + h @ w_hh.T + b_hh
        i_g = jax.nn.sigmoid(gates[:, 0 * H:1 * H])
        f_g = jax.nn.sigmoid(gates[:, 1 * H:2 * H])
        g_g = jnp.tanh(gates[:, 2 * H:3 * H])
        o_g = jax.nn.sigmoid(gates[:, 3 * H:4 * H])
        c = f_g * c + i_g * g_g
        h = o_g * jnp.tanh(c)
        outs.append(h @ w_out.T + b_out)
    return jnp.stack(outs, axis=1), (h[None], c[None])


if __name__ == "__main__":
    B, T, I, H = 2, 8, 16, 32

    key = jax.random.PRNGKey(0)
    ks = jax.random.split(key, 9)
    k = 1.0 / np.sqrt(H)  # PyTorch default init bound

    # nn.LSTM (num_layers=1): weight_ih_l0 [4H, I], weight_hh_l0 [4H, H],
    # bias_ih_l0 [4H], bias_hh_l0 [4H]; nn.Linear(H, 1): weight [1, H], bias [1].
    w_ih = jax.random.uniform(ks[0], (4 * H, I), jnp.float32, -k, k)
    w_hh = jax.random.uniform(ks[1], (4 * H, H), jnp.float32, -k, k)
    b_ih = jax.random.uniform(ks[2], (4 * H,), jnp.float32, -k, k)
    b_hh = jax.random.uniform(ks[3], (4 * H,), jnp.float32, -k, k)
    w_out = jax.random.uniform(ks[4], (1, H), jnp.float32, -k, k)
    b_out = jax.random.uniform(ks[5], (1,), jnp.float32, -k, k)
    params = (w_ih, w_hh, b_ih, b_hh, w_out, b_out)

    x = jax.random.normal(ks[6], (B, T, I), jnp.float32)
    h0 = jax.random.normal(ks[7], (1, B, H), jnp.float32)
    c0 = jax.random.normal(ks[8], (1, B, H), jnp.float32)

    out, (h_n, c_n) = lstm_forward(x, (h0, c0), params)
    jax.block_until_ready((out, h_n, c_n))

    ref_out, (ref_h, ref_c) = lstm_reference(x, (h0, c0), params)
    # Tolerance covers the bf16 gates_x / W_hh streams (state & accumulation stay f32).
    np.testing.assert_allclose(np.asarray(out), np.asarray(ref_out), rtol=2e-2, atol=2e-2)
    np.testing.assert_allclose(np.asarray(h_n), np.asarray(ref_h), rtol=2e-2, atol=2e-2)
    np.testing.assert_allclose(np.asarray(c_n), np.asarray(ref_c), rtol=2e-2, atol=2e-2)

    assert out.shape == (B, T, 1) and h_n.shape == (1, B, H) and c_n.shape == (1, B, H)
    print("KERNEL_OK")
</pallas_src>

<mosaic_0001>
module attributes {stable_mosaic.version = 11 : i64} {
  func.func @lstm_chunk_kernel(%arg0: i32, %arg1: i32, %arg2: memref<8x8x512xbf16, #tpu.memory_space<vmem>>, %arg3: memref<8x128xf32, #tpu.memory_space<vmem>>, %arg4: memref<8x128xf32, #tpu.memory_space<vmem>>, %arg5: memref<128x512xbf16, #tpu.memory_space<vmem>>, %arg6: memref<1x128xf32, #tpu.memory_space<vmem>>, %arg7: memref<1x8x8xf32, #tpu.memory_space<vmem>>, %arg8: memref<8x128xf32, #tpu.memory_space<vmem>>, %arg9: memref<8x128xf32, #tpu.memory_space<vmem>>, %arg10: memref<8x128xf32, #tpu.memory_space<vmem>>, %arg11: memref<8x128xf32, #tpu.memory_space<vmem>>, %arg12: memref<8x8x128xf32, #tpu.memory_space<vmem>>) attributes {dimension_semantics = [#tpu.dimension_semantics<parallel>, #tpu.dimension_semantics<arbitrary>], iteration_bounds = array<i64: 1, 1>, scalar_prefetch = 0 : i64, scratch_operands = 3 : i64, tpu.core_type = #tpu.core_type<tc>, window_params = [{transform_indices = @transform_0, window_bounds = array<i64: 8, 8, 512>}, {transform_indices = @transform_1, window_bounds = array<i64: 8, 128>}, {transform_indices = @transform_2, window_bounds = array<i64: 8, 128>}, {pipeline_mode = #tpu.pipeline_mode<synchronous>, transform_indices = @transform_3, window_bounds = array<i64: 128, 512>}, {pipeline_mode = #tpu.pipeline_mode<synchronous>, transform_indices = @transform_4, window_bounds = array<i64: 1, 128>}, {transform_indices = @transform_5, window_bounds = array<i64: 1, 8, 8>}, {transform_indices = @transform_6, window_bounds = array<i64: 8, 128>}, {transform_indices = @transform_7, window_bounds = array<i64: 8, 128>}]} {
    %c0_i32 = arith.constant 0 : i32
    %0 = arith.cmpi eq, %arg1, %c0_i32 : i32
    %1 = arith.extui %0 : i1 to i32
    %c0_i32_0 = arith.constant 0 : i32
    %2 = arith.cmpi ne, %1, %c0_i32_0 : i32
    scf.if %2 {
      %c0_93 = arith.constant 0 : index
      %c0_94 = arith.constant 0 : index
      %292 = vector.load %arg3[%c0_93, %c0_94] : memref<8x128xf32, #tpu.memory_space<vmem>>, vector<8x128xf32>
      %c0_95 = arith.constant 0 : index
      %c0_96 = arith.constant 0 : index
      %293 = vector.load %arg10[%c0_95, %c0_96] : memref<8x128xf32, #tpu.memory_space<vmem>>, vector<8x128xf32>
      tpu.vector_store %arg10[%c0_95, %c0_96], %292 {strides = array<i32>} : memref<8x128xf32, #tpu.memory_space<vmem>>, vector<8x128xf32>,
      %c0_97 = arith.constant 0 : index
      %c0_98 = arith.constant 0 : index
      %294 = vector.load %arg4[%c0_97, %c0_98] : memref<8x128xf32, #tpu.memory_space<vmem>>, vector<8x128xf32>
      %c0_99 = arith.constant 0 : index
      %c0_100 = arith.constant 0 : index
      %295 = vector.load %arg11[%c0_99, %c0_100] : memref<8x128xf32, #tpu.memory_space<vmem>>, vector<8x128xf32>
      tpu.vector_store %arg11[%c0_99, %c0_100], %294 {strides = array<i32>} : memref<8x128xf32, #tpu.memory_space<vmem>>, vector<8x128xf32>,
    } else {
    }
    %c0 = arith.constant 0 : index
    %c0_1 = arith.constant 0 : index
    %3 = vector.load %arg10[%c0, %c0_1] : memref<8x128xf32, #tpu.memory_space<vmem>>, vector<8x128xf32>
    %c0_2 = arith.constant 0 : index
    %c0_3 = arith.constant 0 : index
    %4 = vector.load %arg11[%c0_2, %c0_3] : memref<8x128xf32, #tpu.memory_space<vmem>>, vector<8x128xf32>
    %c0_4 = arith.constant 0 : index
    %c0_5 = arith.constant 0 : index
    %5 = vector.load %arg5[%c0_4, %c0_5] : memref<128x512xbf16, #tpu.memory_space<vmem>>, vector<128x512xbf16>
    %c0_6 = arith.constant 0 : index
    %c0_7 = arith.constant 0 : index
    %c0_8 = arith.constant 0 : index
    %6 = vector.load %arg2[%c0_6, %c0_7, %c0_8] : memref<8x8x512xbf16, #tpu.memory_space<vmem>>, vector<1x8x512xbf16>
    %7 = vector.shape_cast %6 : vector<1x8x512xbf16> to vector<8x512xbf16>
    %8 = arith.extf %7 : vector<8x512xbf16> to vector<8x512xf32>
    %9 = arith.truncf %3 : vector<8x128xf32> to vector<8x128xbf16>
    %cst = arith.constant dense<0.000000e+00> : vector<8x512xf32>
    %10 = tpu.matmul %9, %5, %cst {dimension_numbers = #tpu.dot_dimension_numbers<[1], [0], [0], [1], [0, 0, 1, 1], [], []>} : vector<8x128xbf16>, vector<128x512xbf16>, vector<8x512xf32> -> vector<8x512xf32>
    %11 = arith.addf %8, %10 : vector<8x512xf32>
    %12 = vector.extract_strided_slice %11 {offsets = [0, 0], sizes = [8, 128], strides = [1, 1]} : vector<8x512xf32> to vector<8x128xf32>
    %13 = arith.negf %12 : vector<8x128xf32>
    %14 = math.exp %13 : vector<8x128xf32>
    %cst_9 = arith.constant 1.000000e+00 : f32
    %15 = vector.broadcast %cst_9 : f32 to vector<8x128xf32>
    %16 = arith.addf %15, %14 : vector<8x128xf32>
    %17 = arith.divf %15, %16 : vector<8x128xf32>
    %18 = vector.extract_strided_slice %11 {offsets = [0, 128], sizes = [8, 128], strides = [1, 1]} : vector<8x512xf32> to vector<8x128xf32>
    %19 = arith.negf %18 : vector<8x128xf32>
    %20 = math.exp %19 : vector<8x128xf32>
    %cst_10 = arith.constant 1.000000e+00 : f32
    %21 = vector.broadcast %cst_10 : f32 to vector<8x128xf32>
    %22 = arith.addf %21, %20 : vector<8x128xf32>
    %23 = arith.divf %21, %22 : vector<8x128xf32>
    %24 = vector.extract_strided_slice %11 {offsets = [0, 256], sizes = [8, 128], strides = [1, 1]} : vector<8x512xf32> to vector<8x128xf32>
    %25 = math.tanh %24 : vector<8x128xf32>
    %26 = vector.extract_strided_slice %11 {offsets = [0, 384], sizes = [8, 128], strides = [1, 1]} : vector<8x512xf32> to vector<8x128xf32>
    %27 = arith.negf %26 : vector<8x128xf32>
    %28 = math.exp %27 : vector<8x128xf32>
    %cst_11 = arith.constant 1.000000e+00 : f32
    %29 = vector.broadcast %cst_11 : f32 to vector<8x128xf32>
    %30 = arith.addf %29, %28 : vector<8x128xf32>
    %31 = arith.divf %29, %30 : vector<8x128xf32>
    %32 = arith.mulf %23, %4 : vector<8x128xf32>
    %33 = arith.mulf %17, %25 : vector<8x128xf32>
    %34 = arith.addf %32, %33 : vector<8x128xf32>
    %35 = math.tanh %34 : vector<8x128xf32>
    %36 = arith.mulf %31, %35 : vector<8x128xf32>
    %c0_12 = arith.constant 0 : index
    %c0_13 = arith.constant 0 : index
    %c0_14 = arith.constant 0 : index
    %37 = vector.load %arg12[%c0_12, %c0_13, %c0_14] : memref<8x8x128xf32, #tpu.memory_space<vmem>>, vector<1x8x128xf32>
    %38 = vector.shape_cast %37 : vector<1x8x128xf32> to vector<8x128xf32>
    %39 = vector.shape_cast %36 : vector<8x128xf32> to vector<1x8x128xf32>
    tpu.vector_store %arg12[%c0_12, %c0_13, %c0_14], %39 {strides = array<i32>} : memref<8x8x128xf32, #tpu.memory_space<vmem>>, vector<1x8x128xf32>,
    %c1 = arith.constant 1 : index
    %c0_15 = arith.constant 0 : index
    %c0_16 = arith.constant 0 : index
    %40 = vector.load %arg2[%c1, %c0_15, %c0_16] : memref<8x8x512xbf16, #tpu.memory_space<vmem>>, vector<1x8x512xbf16>
    %41 = vector.shape_cast %40 : vector<1x8x512xbf16> to vector<8x512xbf16>
    %42 = arith.extf %41 : vector<8x512xbf16> to vector<8x512xf32>
    %43 = arith.truncf %36 : vector<8x128xf32> to vector<8x128xbf16>
    %cst_17 = arith.constant dense<0.000000e+00> : vector<8x512xf32>
    %44 = tpu.matmul %43, %5, %cst_17 {dimension_numbers = #tpu.dot_dimension_numbers<[1], [0], [0], [1], [0, 0, 1, 1], [], []>} : vector<8x128xbf16>, vector<128x512xbf16>, vector<8x512xf32> -> vector<8x512xf32>
    %45 = arith.addf %42, %44 : vector<8x512xf32>
    %46 = vector.extract_strided_slice %45 {offsets = [0, 0], sizes = [8, 128], strides = [1, 1]} : vector<8x512xf32> to vector<8x128xf32>
    %47 = arith.negf %46 : vector<8x128xf32>
    %48 = math.exp %47 : vector<8x128xf32>
    %cst_18 = arith.constant 1.000000e+00 : f32
    %49 = vector.broadcast %cst_18 : f32 to vector<8x128xf32>
    %50 = arith.addf %49, %48 : vector<8x128xf32>
    %51 = arith.divf %49, %50 : vector<8x128xf32>
    %52 = vector.extract_strided_slice %45 {offsets = [0, 128], sizes = [8, 128], strides = [1, 1]} : vector<8x512xf32> to vector<8x128xf32>
    %53 = arith.negf %52 : vector<8x128xf32>
    %54 = math.exp %53 : vector<8x128xf32>
    %cst_19 = arith.constant 1.000000e+00 : f32
    %55 = vector.broadcast %cst_19 : f32 to vector<8x128xf32>
    %56 = arith.addf %55, %54 : vector<8x128xf32>
    %57 = arith.divf %55, %56 : vector<8x128xf32>
    %58 = vector.extract_strided_slice %45 {offsets = [0, 256], sizes = [8, 128], strides = [1, 1]} : vector<8x512xf32> to vector<8x128xf32>
    %59 = math.tanh %58 : vector<8x128xf32>
    %60 = vector.extract_strided_slice %45 {offsets = [0, 384], sizes = [8, 128], strides = [1, 1]} : vector<8x512xf32> to vector<8x128xf32>
    %61 = arith.negf %60 : vector<8x128xf32>
    %62 = math.exp %61 : vector<8x128xf32>
    %cst_20 = arith.constant 1.000000e+00 : f32
    %63 = vector.broadcast %cst_20 : f32 to vector<8x128xf32>
    %64 = arith.addf %63, %62 : vector<8x128xf32>
    %65 = arith.divf %63, %64 : vector<8x128xf32>
    %66 = arith.mulf %57, %34 : vector<8x128xf32>
    %67 = arith.mulf %51, %59 : vector<8x128xf32>
    %68 = arith.addf %66, %67 : vector<8x128xf32>
    %69 = math.tanh %68 : vector<8x128xf32>
    %70 = arith.mulf %65, %69 : vector<8x128xf32>
    %c1_21 = arith.constant 1 : index
    %c0_22 = arith.constant 0 : index
    %c0_23 = arith.constant 0 : index
    %71 = vector.load %arg12[%c1_21, %c0_22, %c0_23] : memref<8x8x128xf32, #tpu.memory_space<vmem>>, vector<1x8x128xf32>
    %72 = vector.shape_cast %71 : vector<1x8x128xf32> to vector<8x128xf32>
    %73 = vector.shape_cast %70 : vector<8x128xf32> to vector<1x8x128xf32>
    tpu.vector_store %arg12[%c1_21, %c0_22, %c0_23], %73 {strides = array<i32>} : memref<8x8x128xf32, #tpu.memory_space<vmem>>, vector<1x8x128xf32>,
    %c2 = arith.constant 2 : index
    %c0_24 = arith.constant 0 : index
    %c0_25 = arith.constant 0 : index
    %74 = vector.load %arg2[%c2, %c0_24, %c0_25] : memref<8x8x512xbf16, #tpu.memory_space<vmem>>, vector<1x8x512xbf16>
    %75 = vector.shape_cast %74 : vector<1x8x512xbf16> to vector<8x512xbf16>
    %76 = arith.extf %75 : vector<8x512xbf16> to vector<8x512xf32>
    %77 = arith.truncf %70 : vector<8x128xf32> to vector<8x128xbf16>
    %cst_26 = arith.constant dense<0.000000e+00> : vector<8x512xf32>
    %78 = tpu.matmul %77, %5, %cst_26 {dimension_numbers = #tpu.dot_dimension_numbers<[1], [0], [0], [1], [0, 0, 1, 1], [], []>} : vector<8x128xbf16>, vector<128x512xbf16>, vector<8x512xf32> -> vector<8x512xf32>
    %79 = arith.addf %76, %78 : vector<8x512xf32>
    %80 = vector.extract_strided_slice %79 {offsets = [0, 0], sizes = [8, 128], strides = [1, 1]} : vector<8x512xf32> to vector<8x128xf32>
    %81 = arith.negf %80 : vector<8x128xf32>
    %82 = math.exp %81 : vector<8x128xf32>
    %cst_27 = arith.constant 1.000000e+00 : f32
    %83 = vector.broadcast %cst_27 : f32 to vector<8x128xf32>
    %84 = arith.addf %83, %82 : vector<8x128xf32>
    %85 = arith.divf %83, %84 : vector<8x128xf32>
    %86 = vector.extract_strided_slice %79 {offsets = [0, 128], sizes = [8, 128], strides = [1, 1]} : vector<8x512xf32> to vector<8x128xf32>
    %87 = arith.negf %86 : vector<8x128xf32>
    %88 = math.exp %87 : vector<8x128xf32>
    %cst_28 = arith.constant 1.000000e+00 : f32
    %89 = vector.broadcast %cst_28 : f32 to vector<8x128xf32>
    %90 = arith.addf %89, %88 : vector<8x128xf32>
    %91 = arith.divf %89, %90 : vector<8x128xf32>
    %92 = vector.extract_strided_slice %79 {offsets = [0, 256], sizes = [8, 128], strides = [1, 1]} : vector<8x512xf32> to vector<8x128xf32>
    %93 = math.tanh %92 : vector<8x128xf32>
    %94 = vector.extract_strided_slice %79 {offsets = [0, 384], sizes = [8, 128], strides = [1, 1]} : vector<8x512xf32> to vector<8x128xf32>
    %95 = arith.negf %94 : vector<8x128xf32>
    %96 = math.exp %95 : vector<8x128xf32>
    %cst_29 = arith.constant 1.000000e+00 : f32
    %97 = vector.broadcast %cst_29 : f32 to vector<8x128xf32>
    %98 = arith.addf %97, %96 : vector<8x128xf32>
    %99 = arith.divf %97, %98 : vector<8x128xf32>
    %100 = arith.mulf %91, %68 : vector<8x128xf32>
    %101 = arith.mulf %85, %93 : vector<8x128xf32>
    %102 = arith.addf %100, %101 : vector<8x128xf32>
    %103 = math.tanh %102 : vector<8x128xf32>
    %104 = arith.mulf %99, %103 : vector<8x128xf32>
    %c2_30 = arith.constant 2 : index
    %c0_31 = arith.constant 0 : index
    %c0_32 = arith.constant 0 : index
    %105 = vector.load %arg12[%c2_30, %c0_31, %c0_32] : memref<8x8x128xf32, #tpu.memory_space<vmem>>, vector<1x8x128xf32>
    %106 = vector.shape_cast %105 : vector<1x8x128xf32> to vector<8x128xf32>
    %107 = vector.shape_cast %104 : vector<8x128xf32> to vector<1x8x128xf32>
    tpu.vector_store %arg12[%c2_30, %c0_31, %c0_32], %107 {strides = array<i32>} : memref<8x8x128xf32, #tpu.memory_space<vmem>>, vector<1x8x128xf32>,
    %c3 = arith.constant 3 : index
    %c0_33 = arith.constant 0 : index
    %c0_34 = arith.constant 0 : index
    %108 = vector.load %arg2[%c3, %c0_33, %c0_34] : memref<8x8x512xbf16, #tpu.memory_space<vmem>>, vector<1x8x512xbf16>
    %109 = vector.shape_cast %108 : vector<1x8x512xbf16> to vector<8x512xbf16>
    %110 = arith.extf %109 : vector<8x512xbf16> to vector<8x512xf32>
    %111 = arith.truncf %104 : vector<8x128xf32> to vector<8x128xbf16>
    %cst_35 = arith.constant dense<0.000000e+00> : vector<8x512xf32>
    %112 = tpu.matmul %111, %5, %cst_35 {dimension_numbers = #tpu.dot_dimension_numbers<[1], [0], [0], [1], [0, 0, 1, 1], [], []>} : vector<8x128xbf16>, vector<128x512xbf16>, vector<8x512xf32> -> vector<8x512xf32>
    %113 = arith.addf %110, %112 : vector<8x512xf32>
    %114 = vector.extract_strided_slice %113 {offsets = [0, 0], sizes = [8, 128], strides = [1, 1]} : vector<8x512xf32> to vector<8x128xf32>
    %115 = arith.negf %114 : vector<8x128xf32>
    %116 = math.exp %115 : vector<8x128xf32>
    %cst_36 = arith.constant 1.000000e+00 : f32
    %117 = vector.broadcast %cst_36 : f32 to vector<8x128xf32>
    %118 = arith.addf %117, %116 : vector<8x128xf32>
    %119 = arith.divf %117, %118 : vector<8x128xf32>
    %120 = vector.extract_strided_slice %113 {offsets = [0, 128], sizes = [8, 128], strides = [1, 1]} : vector<8x512xf32> to vector<8x128xf32>
    %121 = arith.negf %120 : vector<8x128xf32>
    %122 = math.exp %121 : vector<8x128xf32>
    %cst_37 = arith.constant 1.000000e+00 : f32
    %123 = vector.broadcast %cst_37 : f32 to vector<8x128xf32>
    %124 = arith.addf %123, %122 : vector<8x128xf32>
    %125 = arith.divf %123, %124 : vector<8x128xf32>
    %126 = vector.extract_strided_slice %113 {offsets = [0, 256], sizes = [8, 128], strides = [1, 1]} : vector<8x512xf32> to vector<8x128xf32>
    %127 = math.tanh %126 : vector<8x128xf32>
    %128 = vector.extract_strided_slice %113 {offsets = [0, 384], sizes = [8, 128], strides = [1, 1]} : vector<8x512xf32> to vector<8x128xf32>
    %129 = arith.negf %128 : vector<8x128xf32>
    %130 = math.exp %129 : vector<8x128xf32>
    %cst_38 = arith.constant 1.000000e+00 : f32
    %131 = vector.broadcast %cst_38 : f32 to vector<8x128xf32>
    %132 = arith.addf %131, %130 : vector<8x128xf32>
    %133 = arith.divf %131, %132 : vector<8x128xf32>
    %134 = arith.mulf %125, %102 : vector<8x128xf32>
    %135 = arith.mulf %119, %127 : vector<8x128xf32>
    %136 = arith.addf %134, %135 : vector<8x128xf32>
    %137 = math.tanh %136 : vector<8x128xf32>
    %138 = arith.mulf %133, %137 : vector<8x128xf32>
    %c3_39 = arith.constant 3 : index
    %c0_40 = arith.constant 0 : index
    %c0_41 = arith.constant 0 : index
    %139 = vector.load %arg12[%c3_39, %c0_40, %c0_41] : memref<8x8x128xf32, #tpu.memory_space<vmem>>, vector<1x8x128xf32>
    %140 = vector.shape_cast %139 : vector<1x8x128xf32> to vector<8x128xf32>
    %141 = vector.shape_cast %138 : vector<8x128xf32> to vector<1x8x128xf32>
    tpu.vector_store %arg12[%c3_39, %c0_40, %c0_41], %141 {strides = array<i32>} : memref<8x8x128xf32, #tpu.memory_space<vmem>>, vector<1x8x128xf32>,
    %c4 = arith.constant 4 : index
    %c0_42 = arith.constant 0 : index
    %c0_43 = arith.constant 0 : index
    %142 = vector.load %arg2[%c4, %c0_42, %c0_43] : memref<8x8x512xbf16, #tpu.memory_space<vmem>>, vector<1x8x512xbf16>
    %143 = vector.shape_cast %142 : vector<1x8x512xbf16> to vector<8x512xbf16>
    %144 = arith.extf %143 : vector<8x512xbf16> to vector<8x512xf32>
    %145 = arith.truncf %138 : vector<8x128xf32> to vector<8x128xbf16>
    %cst_44 = arith.constant dense<0.000000e+00> : vector<8x512xf32>
    %146 = tpu.matmul %145, %5, %cst_44 {dimension_numbers = #tpu.dot_dimension_numbers<[1], [0], [0], [1], [0, 0, 1, 1], [], []>} : vector<8x128xbf16>, vector<128x512xbf16>, vector<8x512xf32> -> vector<8x512xf32>
    %147 = arith.addf %144, %146 : vector<8x512xf32>
    %148 = vector.extract_strided_slice %147 {offsets = [0, 0], sizes = [8, 128], strides = [1, 1]} : vector<8x512xf32> to vector<8x128xf32>
    %149 = arith.negf %148 : vector<8x128xf32>
    %150 = math.exp %149 : vector<8x128xf32>
    %cst_45 = arith.constant 1.000000e+00 : f32
    %151 = vector.broadcast %cst_45 : f32 to vector<8x128xf32>
    %152 = arith.addf %151, %150 : vector<8x128xf32>
    %153 = arith.divf %151, %152 : vector<8x128xf32>
    %154 = vector.extract_strided_slice %147 {offsets = [0, 128], sizes = [8, 128], strides = [1, 1]} : vector<8x512xf32> to vector<8x128xf32>
    %155 = arith.negf %154 : vector<8x128xf32>
    %156 = math.exp %155 : vector<8x128xf32>
    %cst_46 = arith.constant 1.000000e+00 : f32
    %157 = vector.broadcast %cst_46 : f32 to vector<8x128xf32>
    %158 = arith.addf %157, %156 : vector<8x128xf32>
    %159 = arith.divf %157, %158 : vector<8x128xf32>
    %160 = vector.extract_strided_slice %147 {offsets = [0, 256], sizes = [8, 128], strides = [1, 1]} : vector<8x512xf32> to vector<8x128xf32>
    %161 = math.tanh %160 : vector<8x128xf32>
    %162 = vector.extract_strided_slice %147 {offsets = [0, 384], sizes = [8, 128], strides = [1, 1]} : vector<8x512xf32> to vector<8x128xf32>
    %163 = arith.negf %162 : vector<8x128xf32>
    %164 = math.exp %163 : vector<8x128xf32>
    %cst_47 = arith.constant 1.000000e+00 : f32
    %165 = vector.broadcast %cst_47 : f32 to vector<8x128xf32>
    %166 = arith.addf %165, %164 : vector<8x128xf32>
    %167 = arith.divf %165, %166 : vector<8x128xf32>
    %168 = arith.mulf %159, %136 : vector<8x128xf32>
    %169 = arith.mulf %153, %161 : vector<8x128xf32>
    %170 = arith.addf %168, %169 : vector<8x128xf32>
    %171 = math.tanh %170 : vector<8x128xf32>
    %172 = arith.mulf %167, %171 : vector<8x128xf32>
    %c4_48 = arith.constant 4 : index
    %c0_49 = arith.constant 0 : index
    %c0_50 = arith.constant 0 : index
    %173 = vector.load %arg12[%c4_48, %c0_49, %c0_50] : memref<8x8x128xf32, #tpu.memory_space<vmem>>, vector<1x8x128xf32>
    %174 = vector.shape_cast %173 : vector<1x8x128xf32> to vector<8x128xf32>
    %175 = vector.shape_cast %172 : vector<8x128xf32> to vector<1x8x128xf32>
    tpu.vector_store %arg12[%c4_48, %c0_49, %c0_50], %175 {strides = array<i32>} : memref<8x8x128xf32, #tpu.memory_space<vmem>>, vector<1x8x128xf32>,
    %c5 = arith.constant 5 : index
    %c0_51 = arith.constant 0 : index
    %c0_52 = arith.constant 0 : index
    %176 = vector.load %arg2[%c5, %c0_51, %c0_52] : memref<8x8x512xbf16, #tpu.memory_space<vmem>>, vector<1x8x512xbf16>
    %177 = vector.shape_cast %176 : vector<1x8x512xbf16> to vector<8x512xbf16>
    %178 = arith.extf %177 : vector<8x512xbf16> to vector<8x512xf32>
    %179 = arith.truncf %172 : vector<8x128xf32> to vector<8x128xbf16>
    %cst_53 = arith.constant dense<0.000000e+00> : vector<8x512xf32>
    %180 = tpu.matmul %179, %5, %cst_53 {dimension_numbers = #tpu.dot_dimension_numbers<[1], [0], [0], [1], [0, 0, 1, 1], [], []>} : vector<8x128xbf16>, vector<128x512xbf16>, vector<8x512xf32> -> vector<8x512xf32>
    %181 = arith.addf %178, %180 : vector<8x512xf32>
    %182 = vector.extract_strided_slice %181 {offsets = [0, 0], sizes = [8, 128], strides = [1, 1]} : vector<8x512xf32> to vector<8x128xf32>
    %183 = arith.negf %182 : vector<8x128xf32>
    %184 = math.exp %183 : vector<8x128xf32>
    %cst_54 = arith.constant 1.000000e+00 : f32
    %185 = vector.broadcast %cst_54 : f32 to vector<8x128xf32>
    %186 = arith.addf %185, %184 : vector<8x128xf32>
    %187 = arith.divf %185, %186 : vector<8x128xf32>
    %188 = vector.extract_strided_slice %181 {offsets = [0, 128], sizes = [8, 128], strides = [1, 1]} : vector<8x512xf32> to vector<8x128xf32>
    %189 = arith.negf %188 : vector<8x128xf32>
    %190 = math.exp %189 : vector<8x128xf32>
    %cst_55 = arith.constant 1.000000e+00 : f32
    %191 = vector.broadcast %cst_55 : f32 to vector<8x128xf32>
    %192 = arith.addf %191, %190 : vector<8x128xf32>
    %193 = arith.divf %191, %192 : vector<8x128xf32>
    %194 = vector.extract_strided_slice %181 {offsets = [0, 256], sizes = [8, 128], strides = [1, 1]} : vector<8x512xf32> to vector<8x128xf32>
    %195 = math.tanh %194 : vector<8x128xf32>
    %196 = vector.extract_strided_slice %181 {offsets = [0, 384], sizes = [8, 128], strides = [1, 1]} : vector<8x512xf32> to vector<8x128xf32>
    %197 = arith.negf %196 : vector<8x128xf32>
    %198 = math.exp %197 : vector<8x128xf32>
    %cst_56 = arith.constant 1.000000e+00 : f32
    %199 = vector.broadcast %cst_56 : f32 to vector<8x128xf32>
    %200 = arith.addf %199, %198 : vector<8x128xf32>
    %201 = arith.divf %199, %200 : vector<8x128xf32>
    %202 = arith.mulf %193, %170 : vector<8x128xf32>
    %203 = arith.mulf %187, %195 : vector<8x128xf32>
    %204 = arith.addf %202, %203 : vector<8x128xf32>
    %205 = math.tanh %204 : vector<8x128xf32>
    %206 = arith.mulf %201, %205 : vector<8x128xf32>
    %c5_57 = arith.constant 5 : index
    %c0_58 = arith.constant 0 : index
    %c0_59 = arith.constant 0 : index
    %207 = vector.load %arg12[%c5_57, %c0_58, %c0_59] : memref<8x8x128xf32, #tpu.memory_space<vmem>>, vector<1x8x128xf32>
    %208 = vector.shape_cast %207 : vector<1x8x128xf32> to vector<8x128xf32>
    %209 = vector.shape_cast %206 : vector<8x128xf32> to vector<1x8x128xf32>
    tpu.vector_store %arg12[%c5_57, %c0_58, %c0_59], %209 {strides = array<i32>} : memref<8x8x128xf32, #tpu.memory_space<vmem>>, vector<1x8x128xf32>,
    %c6 = arith.constant 6 : index
    %c0_60 = arith.constant 0 : index
    %c0_61 = arith.constant 0 : index
    %210 = vector.load %arg2[%c6, %c0_60, %c0_61] : memref<8x8x512xbf16, #tpu.memory_space<vmem>>, vector<1x8x512xbf16>
    %211 = vector.shape_cast %210 : vector<1x8x512xbf16> to vector<8x512xbf16>
    %212 = arith.extf %211 : vector<8x512xbf16> to vector<8x512xf32>
    %213 = arith.truncf %206 : vector<8x128xf32> to vector<8x128xbf16>
    %cst_62 = arith.constant dense<0.000000e+00> : vector<8x512xf32>
    %214 = tpu.matmul %213, %5, %cst_62 {dimension_numbers = #tpu.dot_dimension_numbers<[1], [0], [0], [1], [0, 0, 1, 1], [], []>} : vector<8x128xbf16>, vector<128x512xbf16>, vector<8x512xf32> -> vector<8x512xf32>
    %215 = arith.addf %212, %214 : vector<8x512xf32>
    %216 = vector.extract_strided_slice %215 {offsets = [0, 0], sizes = [8, 128], strides = [1, 1]} : vector<8x512xf32> to vector<8x128xf32>
    %217 = arith.negf %216 : vector<8x128xf32>
    %218 = math.exp %217 : vector<8x128xf32>
    %cst_63 = arith.constant 1.000000e+00 : f32
    %219 = vector.broadcast %cst_63 : f32 to vector<8x128xf32>
    %220 = arith.addf %219, %218 : vector<8x128xf32>
    %221 = arith.divf %219, %220 : vector<8x128xf32>
    %222 = vector.extract_strided_slice %215 {offsets = [0, 128], sizes = [8, 128], strides = [1, 1]} : vector<8x512xf32> to vector<8x128xf32>
    %223 = arith.negf %222 : vector<8x128xf32>
    %224 = math.exp %223 : vector<8x128xf32>
    %cst_64 = arith.constant 1.000000e+00 : f32
    %225 = vector.broadcast %cst_64 : f32 to vector<8x128xf32>
    %226 = arith.addf %225, %224 : vector<8x128xf32>
    %227 = arith.divf %225, %226 : vector<8x128xf32>
    %228 = vector.extract_strided_slice %215 {offsets = [0, 256], sizes = [8, 128], strides = [1, 1]} : vector<8x512xf32> to vector<8x128xf32>
    %229 = math.tanh %228 : vector<8x128xf32>
    %230 = vector.extract_strided_slice %215 {offsets = [0, 384], sizes = [8, 128], strides = [1, 1]} : vector<8x512xf32> to vector<8x128xf32>
    %231 = arith.negf %230 : vector<8x128xf32>
    %232 = math.exp %231 : vector<8x128xf32>
    %cst_65 = arith.constant 1.000000e+00 : f32
    %233 = vector.broadcast %cst_65 : f32 to vector<8x128xf32>
    %234 = arith.addf %233, %232 : vector<8x128xf32>
    %235 = arith.divf %233, %234 : vector<8x128xf32>
    %236 = arith.mulf %227, %204 : vector<8x128xf32>
    %237 = arith.mulf %221, %229 : vector<8x128xf32>
    %238 = arith.addf %236, %237 : vector<8x128xf32>
    %239 = math.tanh %238 : vector<8x128xf32>
    %240 = arith.mulf %235, %239 : vector<8x128xf32>
    %c6_66 = arith.constant 6 : index
    %c0_67 = arith.constant 0 : index
    %c0_68 = arith.constant 0 : index
    %241 = vector.load %arg12[%c6_66, %c0_67, %c0_68] : memref<8x8x128xf32, #tpu.memory_space<vmem>>, vector<1x8x128xf32>
    %242 = vector.shape_cast %241 : vector<1x8x128xf32> to vector<8x128xf32>
    %243 = vector.shape_cast %240 : vector<8x128xf32> to vector<1x8x128xf32>
    tpu.vector_store %arg12[%c6_66, %c0_67, %c0_68], %243 {strides = array<i32>} : memref<8x8x128xf32, #tpu.memory_space<vmem>>, vector<1x8x128xf32>,
    %c7 = arith.constant 7 : index
    %c0_69 = arith.constant 0 : index
    %c0_70 = arith.constant 0 : index
    %244 = vector.load %arg2[%c7, %c0_69, %c0_70] : memref<8x8x512xbf16, #tpu.memory_space<vmem>>, vector<1x8x512xbf16>
    %245 = vector.shape_cast %244 : vector<1x8x512xbf16> to vector<8x512xbf16>
    %246 = arith.extf %245 : vector<8x512xbf16> to vector<8x512xf32>
    %247 = arith.truncf %240 : vector<8x128xf32> to vector<8x128xbf16>
    %cst_71 = arith.constant dense<0.000000e+00> : vector<8x512xf32>
    %248 = tpu.matmul %247, %5, %cst_71 {dimension_numbers = #tpu.dot_dimension_numbers<[1], [0], [0], [1], [0, 0, 1, 1], [], []>} : vector<8x128xbf16>, vector<128x512xbf16>, vector<8x512xf32> -> vector<8x512xf32>
    %249 = arith.addf %246, %248 : vector<8x512xf32>
    %250 = vector.extract_strided_slice %249 {offsets = [0, 0], sizes = [8, 128], strides = [1, 1]} : vector<8x512xf32> to vector<8x128xf32>
    %251 = arith.negf %250 : vector<8x128xf32>
    %252 = math.exp %251 : vector<8x128xf32>
    %cst_72 = arith.constant 1.000000e+00 : f32
    %253 = vector.broadcast %cst_72 : f32 to vector<8x128xf32>
    %254 = arith.addf %253, %252 : vector<8x128xf32>
    %255 = arith.divf %253, %254 : vector<8x128xf32>
    %256 = vector.extract_strided_slice %249 {offsets = [0, 128], sizes = [8, 128], strides = [1, 1]} : vector<8x512xf32> to vector<8x128xf32>
    %257 = arith.negf %256 : vector<8x128xf32>
    %258 = math.exp %257 : vector<8x128xf32>
    %cst_73 = arith.constant 1.000000e+00 : f32
    %259 = vector.broadcast %cst_73 : f32 to vector<8x128xf32>
    %260 = arith.addf %259, %258 : vector<8x128xf32>
    %261 = arith.divf %259, %260 : vector<8x128xf32>
    %262 = vector.extract_strided_slice %249 {offsets = [0, 256], sizes = [8, 128], strides = [1, 1]} : vector<8x512xf32> to vector<8x128xf32>
    %263 = math.tanh %262 : vector<8x128xf32>
    %264 = vector.extract_strided_slice %249 {offsets = [0, 384], sizes = [8, 128], strides = [1, 1]} : vector<8x512xf32> to vector<8x128xf32>
    %265 = arith.negf %264 : vector<8x128xf32>
    %266 = math.exp %265 : vector<8x128xf32>
    %cst_74 = arith.constant 1.000000e+00 : f32
    %267 = vector.broadcast %cst_74 : f32 to vector<8x128xf32>
    %268 = arith.addf %267, %266 : vector<8x128xf32>
    %269 = arith.divf %267, %268 : vector<8x128xf32>
    %270 = arith.mulf %261, %238 : vector<8x128xf32>
    %271 = arith.mulf %255, %263 : vector<8x128xf32>
    %272 = arith.addf %270, %271 : vector<8x128xf32>
    %273 = math.tanh %272 : vector<8x128xf32>
    %274 = arith.mulf %269, %273 : vector<8x128xf32>
    %c7_75 = arith.constant 7 : index
    %c0_76 = arith.constant 0 : index
    %c0_77 = arith.constant 0 : index
    %275 = vector.load %arg12[%c7_75, %c0_76, %c0_77] : memref<8x8x128xf32, #tpu.memory_space<vmem>>, vector<1x8x128xf32>
    %276 = vector.shape_cast %275 : vector<1x8x128xf32> to vector<8x128xf32>
    %277 = vector.shape_cast %274 : vector<8x128xf32> to vector<1x8x128xf32>
    tpu.vector_store %arg12[%c7_75, %c0_76, %c0_77], %277 {strides = array<i32>} : memref<8x8x128xf32, #tpu.memory_space<vmem>>, vector<1x8x128xf32>,
    %c0_78 = arith.constant 0 : index
    %c0_79 = arith.constant 0 : index
    %278 = vector.load %arg10[%c0_78, %c0_79] : memref<8x128xf32, #tpu.memory_space<vmem>>, vector<8x128xf32>
    tpu.vector_store %arg10[%c0_78, %c0_79], %274 {strides = array<i32>} : memref<8x128xf32, #tpu.memory_space<vmem>>, vector<8x128xf32>,
    %c0_80 = arith.constant 0 : index
    %c0_81 = arith.constant 0 : index
    %279 = vector.load %arg11[%c0_80, %c0_81] : memref<8x128xf32, #tpu.memory_space<vmem>>, vector<8x128xf32>
    tpu.vector_store %arg11[%c0_80, %c0_81], %272 {strides = array<i32>} : memref<8x128xf32, #tpu.memory_space<vmem>>, vector<8x128xf32>,
    %c0_82 = arith.constant 0 : index
    %c0_83 = arith.constant 0 : index
    %280 = vector.load %arg6[%c0_82, %c0_83] : memref<1x128xf32, #tpu.memory_space<vmem>>, vector<1x128xf32>
    %c0_84 = arith.constant 0 : index
    %c0_85 = arith.constant 0 : index
    %c0_86 = arith.constant 0 : index
    %281 = vector.load %arg12[%c0_84, %c0_85, %c0_86] : memref<8x8x128xf32, #tpu.memory_space<vmem>>, vector<8x8x128xf32>
    %282 = vector.shape_cast %280 : vector<1x128xf32> to vector<1x1x128xf32>
    %283 = vector.broadcast %282 : vector<1x1x128xf32> to vector<8x8x128xf32>
    %284 = arith.mulf %281, %283 : vector<8x8x128xf32>
    %cst_87 = arith.constant dense<0.000000e+00> : vector<8x8xf32>
    %285 = vector.multi_reduction <add>, %284, %cst_87 [2] : vector<8x8x128xf32> to vector<8x8xf32>
    %c0_88 = arith.constant 0 : index
    %c0_89 = arith.constant 0 : index
    %c0_90 = arith.constant 0 : index
    %286 = vector.load %arg7[%c0_88, %c0_89, %c0_90] : memref<1x8x8xf32, #tpu.memory_space<vmem>>, vector<1x8x8xf32>
    %287 = vector.shape_cast %286 : vector<1x8x8xf32> to vector<8x8xf32>
    %288 = vector.shape_cast %285 : vector<8x8xf32> to vector<1x8x8xf32>
    tpu.vector_store %arg7[%c0_88, %c0_89, %c0_90], %288 {strides = array<i32>} : memref<1x8x8xf32, #tpu.memory_space<vmem>>, vector<1x8x8xf32>,
    %c0_i32_91 = arith.constant 0 : i32
    %289 = arith.cmpi eq, %arg1, %c0_i32_91 : i32
    %290 = arith.extui %289 : i1 to i32
    %c0_i32_92 = arith.constant 0 : i32
    %291 = arith.cmpi ne, %290, %c0_i32_92 : i32
    scf.if %291 {
      %c0_93 = arith.constant 0 : index
      %c0_94 = arith.constant 0 : index
      %292 = vector.load %arg8[%c0_93, %c0_94] : memref<8x128xf32, #tpu.memory_space<vmem>>, vector<8x128xf32>
      tpu.vector_store %arg8[%c0_93, %c0_94], %274 {strides = array<i32>} : memref<8x128xf32, #tpu.memory_space<vmem>>, vector<8x128xf32>,
      %c0_95 = arith.constant 0 : index
      %c0_96 = arith.constant 0 : index
      %293 = vector.load %arg9[%c0_95, %c0_96] : memref<8x128xf32, #tpu.memory_space<vmem>>, vector<8x128xf32>
      tpu.vector_store %arg9[%c0_95, %c0_96], %272 {strides = array<i32>} : memref<8x128xf32, #tpu.memory_space<vmem>>, vector<8x128xf32>,
    } else {
    }
    return
  }
  func.func @transform_0(%arg0: i32, %arg1: i32) -> (i32, i32, i32) {
    %c0_i32 = arith.constant 0 : i32
    %c0_i32_0 = arith.constant 0 : i32
    return %arg1, %arg0, %c0_i32 : i32, i32, i32
  }
  func.func @transform_1(%arg0: i32, %arg1: i32) -> (i32, i32) {
    %c0_i32 = arith.constant 0 : i32
    %c0_i32_0 = arith.constant 0 : i32
    return %arg0, %c0_i32 : i32, i32
  }
  func.func @transform_2(%arg0: i32, %arg1: i32) -> (i32, i32) {
    %c0_i32 = arith.constant 0 : i32
    %c0_i32_0 = arith.constant 0 : i32
    return %arg0, %c0_i32 : i32, i32
  }
  func.func @transform_3(%arg0: i32, %arg1: i32) -> (i32, i32) {
    %c0_i32 = arith.constant 0 : i32
    %c0_i32_0 = arith.constant 0 : i32
    %c0_i32_1 = arith.constant 0 : i32
    return %c0_i32, %c0_i32_0 : i32, i32
  }
  func.func @transform_4(%arg0: i32, %arg1: i32) -> (i32, i32) {
    %c0_i32 = arith.constant 0 : i32
    %c0_i32_0 = arith.constant 0 : i32
    %c0_i32_1 = arith.constant 0 : i32
    return %c0_i32, %c0_i32_0 : i32, i32
  }
  func.func @transform_5(%arg0: i32, %arg1: i32) -> (i32, i32, i32) {
    %c0_i32 = arith.constant 0 : i32
    %c0_i32_0 = arith.constant 0 : i32
    return %arg0, %arg1, %c0_i32 : i32, i32, i32
  }
  func.func @transform_6(%arg0: i32, %arg1: i32) -> (i32, i32) {
    %c0_i32 = arith.constant 0 : i32
    %c0_i32_0 = arith.constant 0 : i32
    return %arg0, %c0_i32 : i32, i32
  }
  func.func @transform_7(%arg0: i32, %arg1: i32) -> (i32, i32) {
    %c0_i32 = arith.constant 0 : i32
    %c0_i32_0 = arith.constant 0 : i32
    return %arg0, %c0_i32 : i32, i32
  }
}

</mosaic_0001>

<bundles_post_ra>
// kernel: tpu_custom_call.1
= control target key start
LH: loop header
LB: loop body
LE: loop exit
PB: predicated region body
PF: predicated region fallthrough
CT: control target
= control target key end

     0   :  { %13 = vsyncpa [#allocation6], 0  ;;  %s2335_s0 = inlined_call_operand.hbm [shape: bf16[8,8,512], index: 0, kind: input, shape index: {}]   ;;  %s2336_s1 = inlined_call_operand.hbm [shape: f32[8,128], index: 1, kind: input, shape index: {}]   ;;  %s2337_s2 = inlined_call_operand.hbm [shape: f32[8,128], index: 2, kind: input, shape index: {}]   ;;  %s2338_s3 = inlined_call_operand.hbm [shape: bf16[128,512], index: 3, kind: input, shape index: {}]   ;;  %s2339_s4 = inlined_call_operand.vmem [shape: f32[1,128], index: 4, kind: input, shape index: {}]   ;;  %s2340_s5 = inlined_call_operand.hbm [shape: f32[1,8,8], index: 5, kind: output, shape index: {0}]   ;;  %s2341_s6 = inlined_call_operand.hbm [shape: f32[8,128], index: 6, kind: output, shape index: {1}]   ;;  %s2342_s7 = inlined_call_operand.hbm [shape: f32[8,128], index: 7, kind: output, shape index: {2}]  }
   0x1   :  { %14 = vsyncpa [#allocation9], 0 }
   0x2   :  { %15 = vsyncpa [#allocation12], 0 }
   0x3   :  { %16 = vsyncpa [#allocation7], 0 }
   0x4   :  { %17 = vsyncpa [#allocation15], 0  ;;  %s1826_s24 = smov [#allocation8]   ;;  %s1827_s26 = smov [#allocation5]  }
   0x5   :  { %s36_s25 = sshll.u32 %s1826_s24, 4  ;;  %s23_s27 = sshll.u32 %s1827_s26, 4  ;;  %s37_s25 = int_to_ptr.vmem [resolvable:$true] %s36_s25  ;;  %s1876_s27 = int_to_ptr.vmem [resolvable:$true] %s23_s27 }
   0x6   :  { %s1662_s30 = scalar_lea.hbm %s2336_s1, 128 }
   0x7   :  { %p1663_p0 = scmp.ne.s32.totalorder %s2336_s1, %s1662_s30  ;;  %p1666_p1 = scmp.lt.u32.totalorder %s1662_s30, %s2336_s1 }
   0x9   :  { %p1668_p2 = pnand %p1666_p1, %p1663_p0 }
   0xb   :  { %1671 = shalt.err (!%p1668_p2)
}
   0xc   :  { %s1672_s12 = scalar_lea.vmem %s37_s25, 128  ;;  %p1677_p4 = scmp.lt.s32.totalorder %s37_s25, %s37_s25 }
   0xd   :  { %p1673_p3 = scmp.ne.s32.totalorder %s37_s25, %s1672_s12  ;;  %p1678_p5 = scmp.lt.s32.totalorder %s1672_s12, %s1672_s12 }
   0xf   :  { %p1679_p6 = por %p1678_p5, %p1677_p4 }
  0x11   :  { %p1680_p7 = pnand %p1679_p6, %p1673_p3 }
  0x13   :  { %1683 = shalt.err (!%p1680_p7)
}
  0x14   :  { %39 = dma.hbm_to_vmem [thread:$0]  %s2336_s1, 128, %s37_s25, [#allocation9]  }
  0x15   :  { %s1684_s17 = scalar_lea.hbm %s2335_s0, 2048 }
  0x16   :  { %p1685_p8 = scmp.ne.s32.totalorder %s2335_s0, %s1684_s17  ;;  %p1688_p9 = scmp.lt.u32.totalorder %s1684_s17, %s2335_s0 }
  0x18   :  { %p1690_p10 = pnand %p1688_p9, %p1685_p8 }
  0x1a   :  { %1693 = shalt.err (!%p1690_p10)
}
  0x1b   :  { %s1694_s22 = scalar_lea.vmem %s1876_s27, 2048  ;;  %p1699_p12 = scmp.lt.s32.totalorder %s1876_s27, %s1876_s27 }
  0x1c   :  { %p1695_p11 = scmp.ne.s32.totalorder %s1876_s27, %s1694_s22  ;;  %p1700_p13 = scmp.lt.s32.totalorder %s1694_s22, %s1694_s22 }
  0x1e   :  { %p1701_p0 = por %p1700_p13, %p1699_p12 }
  0x20   :  { %p1702_p1 = pnand %p1701_p0, %p1695_p11 }
  0x22   :  { %1705 = shalt.err (!%p1702_p1)
}
  0x23   :  { %s1828_s1 = smov 256   ;;  %s1829_s23 = smov 16  }
  0x24   :  { %29 = dma.hbm_to_vmem [thread:$0]  %s2335_s0, 2048, %s1876_s27, [#allocation6], %s1828_s1, %s1828_s1, %s1829_s23  }
  0x25   :  { %s1830_s26 = smov [#allocation10]   ;;  %s1831_s29 = smov [#allocation11]  }
  0x26   :  { %s46_s28 = sshll.u32 %s1830_s26, 4  ;;  %s55_s30 = sshll.u32 %s1831_s29, 4  ;;  %s47_s28 = int_to_ptr.vmem [resolvable:$true] %s46_s28  ;;  %s1910_s30 = int_to_ptr.vmem [resolvable:$true] %s55_s30 }
  0x27   :  { %s1706_s10 = scalar_lea.hbm %s2337_s2, 128 }
  0x28   :  { %p1707_p2 = scmp.ne.s32.totalorder %s2337_s2, %s1706_s10  ;;  %p1710_p3 = scmp.lt.u32.totalorder %s1706_s10, %s2337_s2 }
  0x2a   :  { %p1712_p4 = pnand %p1710_p3, %p1707_p2 }
  0x2c   :  { %1715 = shalt.err (!%p1712_p4)
}
  0x2d   :  { %s1716_s0 = scalar_lea.vmem %s47_s28, 128  ;;  %p1721_p6 = scmp.lt.s32.totalorder %s47_s28, %s47_s28 }
  0x2e   :  { %p1717_p5 = scmp.ne.s32.totalorder %s47_s28, %s1716_s0  ;;  %p1722_p7 = scmp.lt.s32.totalorder %s1716_s0, %s1716_s0 }
  0x30   :  { %p1723_p8 = por %p1722_p7, %p1721_p6 }
  0x32   :  { %p1724_p9 = pnand %p1723_p8, %p1717_p5 }
  0x34   :  { %1727 = shalt.err (!%p1724_p9)
}
  0x35   :  { %49 = dma.hbm_to_vmem [thread:$0]  %s2337_s2, 128, %s47_s28, [#allocation9]  }
  0x36   :  { %s1728_s18 = scalar_lea.hbm %s2338_s3, 4096 }
  0x37   :  { %p1729_p10 = scmp.ne.s32.totalorder %s2338_s3, %s1728_s18  ;;  %p1732_p11 = scmp.lt.u32.totalorder %s1728_s18, %s2338_s3 }
  0x39   :  { %p1734_p12 = pnand %p1732_p11, %p1729_p10 }
  0x3b   :  { %1737 = shalt.err (!%p1734_p12)
}
  0x3c   :  { %s1738_s24 = scalar_lea.vmem %s1910_s30, 4096  ;;  %p1743_p0 = scmp.lt.s32.totalorder %s1910_s30, %s1910_s30 }
  0x3d   :  { %p1739_p13 = scmp.ne.s32.totalorder %s1910_s30, %s1738_s24  ;;  %p1744_p1 = scmp.lt.s32.totalorder %s1738_s24, %s1738_s24 }
  0x3f   :  { %p1745_p2 = por %p1744_p1, %p1743_p0 }
  0x41   :  { %p1746_p3 = pnand %p1745_p2, %p1739_p13 }
  0x43   :  { %1749 = shalt.err (!%p1746_p3)
}
  0x44   :  { %61 = dma.hbm_to_vmem [thread:$0]  %s2338_s3, 4096, %s1910_s30, [#allocation12], %s1828_s1, %s1828_s1, %s1829_s23  }
  0x45   :  { %1816 = dma.done.wait [#allocation6], 2048  }
  0x46   :  { %1817 = vsyncadd [#allocation6], 4294965248 }
  0x47   :  { %1818 = dma.done.wait [#allocation9], 256  }
  0x48   :  { %1819 = vsyncadd [#allocation9], 4294967040 }
  0x49   :  { %1820 = dma.done.wait [#allocation12], 4096  }
  0x4a   :  { %1821 = vsyncadd [#allocation12], 4294963200  ;;  %v1832_v0 = vmov 0   ;;  %v1946_v1 = vld [vmem:[#allocation11 + $0x4] ss:$16 sps:$4 sm:$0xff]   ;;  %v120_v39 = vld [vmem:[#allocation5 + $0x8] sm:$0xff] }
  0x4b   :  { %318 = vmatprep.mubr.bf16.mxu0 %v1832_v0  ;;  %359 = vmatprep.mubr.bf16.mxu1 %v1832_v0  ;;  %v1948_v2 = vld [vmem:[#allocation11] ss:$16 sps:$4 sm:$0xff]   ;;  %v1951_v3 = vld [vmem:[#allocation11 + $0x24] ss:$16 sps:$4 sm:$0xff]   ;;  %v1959_v6 = vld [vmem:[#allocation11 + $0xc] ss:$16 sps:$4 sm:$0xff]   ;;  %v124_v46 = vunpack.c.h.bf16 %v120_v39  ;;  %v123_v52 = vunpack.c.l.bf16 %v120_v39 }
  0x4c   :  { %286 = vmatprep.subr.bf16.mxu0 %v1946_v1  ;;  %v1954_v4 = vld [vmem:[#allocation11 + $0x20] ss:$16 sps:$4 sm:$0xff]   ;;  %v1957_v5 = vld [vmem:[#allocation11 + $0x44] ss:$16 sps:$4 sm:$0xff]   ;;  %v1961_v7 = vld [vmem:[#allocation11 + $0x8] ss:$16 sps:$4 sm:$0xff]   ;;  %327 = vmatprep.subr.bf16.mxu1 %v1959_v6 }
  0x4d   :  { %287 = vmatpush1.bf16.msra.mxu0 %v1948_v2  ;;  %v1964_v8 = vld [vmem:[#allocation11 + $0x40] ss:$16 sps:$4 sm:$0xff]   ;;  %v1968_v9 = vld [vmem:[#allocation11 + $0x64] ss:$16 sps:$4 sm:$0xff]   ;;  %328 = vmatpush1.bf16.msra.mxu1 %v1961_v7  ;;  %v1971_v10 = vld [vmem:[#allocation11 + $0x2c] ss:$16 sps:$4 sm:$0xff]  }
  0x4e   :  { %288 = vmatprep.subr.bf16.mxu0 %v1951_v3  ;;  %v1973_v11 = vld [vmem:[#allocation11 + $0x28] ss:$16 sps:$4 sm:$0xff]   ;;  %329 = vmatprep.subr.bf16.mxu1 %v1971_v10  ;;  %v1977_v12 = vld [vmem:[#allocation11 + $0x60] ss:$16 sps:$4 sm:$0xff]   ;;  %v1979_v13 = vld [vmem:[#allocation11 + $0x84] ss:$16 sps:$4 sm:$0xff]  }
  0x4f   :  { %v1981_v14 = vld [vmem:[#allocation11 + $0x4c] ss:$16 sps:$4 sm:$0xff]   ;;  %v1985_v15 = vld [vmem:[#allocation11 + $0x48] ss:$16 sps:$4 sm:$0xff]   ;;  %v1991_v17 = vld [vmem:[#allocation11 + $0x80] ss:$16 sps:$4 sm:$0xff]  }
  0x50   :  { %v1988_v16 = vld [vmem:[#allocation11 + $0x6c] ss:$16 sps:$4 sm:$0xff]   ;;  %v1994_v18 = vld [vmem:[#allocation11 + $0xa4] ss:$16 sps:$4 sm:$0xff]   ;;  %v1997_v19 = vld [vmem:[#allocation11 + $0x68] ss:$16 sps:$4 sm:$0xff]  }
  0x51   :  { %289 = vmatpush1.bf16.msra.mxu0 %v1954_v4  ;;  %330 = vmatpush1.bf16.msra.mxu1 %v1973_v11  ;;  %v2000_v20 = vld [vmem:[#allocation11 + $0x8c] ss:$16 sps:$4 sm:$0xff]   ;;  %v2002_v21 = vld [vmem:[#allocation11 + $0xa0] ss:$16 sps:$4 sm:$0xff]   ;;  %v2005_v22 = vld [vmem:[#allocation11 + $0xc4] ss:$16 sps:$4 sm:$0xff]  }
  0x52   :  { %290 = vmatprep.subr.bf16.mxu0 %v1957_v5  ;;  %331 = vmatprep.subr.bf16.mxu1 %v1981_v14  ;;  %v2009_v23 = vld [vmem:[#allocation11 + $0x88] ss:$16 sps:$4 sm:$0xff]   ;;  %v2012_v24 = vld [vmem:[#allocation11 + $0xac] ss:$16 sps:$4 sm:$0xff]   ;;  %v2015_v25 = vld [vmem:[#allocation11 + $0xc0] ss:$16 sps:$4 sm:$0xff]  }
  0x53   :  { %v2018_v26 = vld [vmem:[#allocation11 + $0xe4] ss:$16 sps:$4 sm:$0xff]   ;;  %v2021_v27 = vld [vmem:[#allocation11 + $0xa8] ss:$16 sps:$4 sm:$0xff]   ;;  %v2024_v28 = vld [vmem:[#allocation11 + $0xcc] ss:$16 sps:$4 sm:$0xff]  }
  0x54   :  { %v2027_v29 = vld [vmem:[#allocation11 + $0xe0] ss:$16 sps:$4 sm:$0xff]   ;;  %v2031_v31 = vld [vmem:[#allocation11 + $0xc8] ss:$16 sps:$4 sm:$0xff]   ;;  %v2034_v32 = vld [vmem:[#allocation11 + $0xec] ss:$16 sps:$4 sm:$0xff]  }
  0x55   :  { %291 = vmatpush1.bf16.msra.mxu0 %v1964_v8  ;;  %332 = vmatpush1.bf16.msra.mxu1 %v1985_v15  ;;  %v81_v30 = vld [vmem:[#allocation8] sm:$0xff]  ;;  %v2038_v34 = vld [vmem:[#allocation11 + $0xe8] ss:$16 sps:$4 sm:$0xff]   ;;  %s1833_s28 = smov [#allocation14]  }
  0x56   :  { %292 = vmatprep.subr.bf16.mxu0 %v1968_v9  ;;  %333 = vmatprep.subr.bf16.mxu1 %v1988_v16  ;;  %v125_v33 = vpack.c.bf16 %v81_v30, %v81_v30  ;;  %v119_v35 = vld [vmem:[#allocation5] sm:$0xff]  ;;  %v83_v62 = vld [vmem:[#allocation10] sm:$0xff]  ;;  %s1358_s29 = sshll.u32 %s1833_s28, 4  ;;  %s1359_s29 = int_to_ptr.vmem [resolvable:$true] %s1358_s29 }
  0x57   :  { %v121_v36 = vunpack.c.l.bf16 %v119_v35  ;;  %v122_v37 = vunpack.c.h.bf16 %v119_v35  ;;  %s1750_s30 = scalar_lea.vmem %s1359_s29, 128  ;;  %p1755_p5 = scmp.lt.s32.totalorder %s1359_s29, %s1359_s29 }
  0x58   :  { %p1751_p4 = scmp.ne.s32.totalorder %s1359_s29, %s1750_s30  ;;  %p1756_p6 = scmp.lt.s32.totalorder %s1750_s30, %s1750_s30 }
  0x59   :  { %293 = vmatpush1.bf16.msra.mxu0 %v1977_v12  ;;  %334 = vmatpush1.bf16.msra.mxu1 %v1997_v19 }
  0x5a   :  { %294 = vmatprep.subr.bf16.mxu0 %v1979_v13  ;;  %335 = vmatprep.subr.bf16.mxu1 %v2000_v20  ;;  %p1757_p7 = por %p1756_p6, %p1755_p5 }
  0x5c   :  { %p1758_p8 = pnand %p1757_p7, %p1751_p4 }
  0x5d   :  { %295 = vmatpush1.bf16.msra.mxu0 %v1991_v17  ;;  %336 = vmatpush1.bf16.msra.mxu1 %v2009_v23 }
  0x5e   :  { %296 = vmatprep.subr.bf16.mxu0 %v1994_v18  ;;  %337 = vmatprep.subr.bf16.mxu1 %v2012_v24 }
  0x61   :  { %297 = vmatpush1.bf16.msra.mxu0 %v2002_v21  ;;  %338 = vmatpush1.bf16.msra.mxu1 %v2021_v27 }
  0x62   :  { %298 = vmatprep.subr.bf16.mxu0 %v2005_v22  ;;  %339 = vmatprep.subr.bf16.mxu1 %v2024_v28 }
  0x65   :  { %299 = vmatpush1.bf16.msra.mxu0 %v2015_v25  ;;  %340 = vmatpush1.bf16.msra.mxu1 %v2031_v31 }
  0x66   :  { %300 = vmatprep.subr.bf16.mxu0 %v2018_v26  ;;  %341 = vmatprep.subr.bf16.mxu1 %v2034_v32 }
  0x69   :  { %301 = vmatpush1.bf16.msra.mxu0 %v2027_v29  ;;  %342 = vmatpush1.bf16.msra.mxu1 %v2038_v34 }
  0x6a   :  { %405 = vmatprep.subr.bf16.mxu0 %v1946_v1  ;;  %446 = vmatprep.subr.bf16.mxu1 %v1959_v6 }
  0x6c   :  { %319 = vmatmul.mubr.bf16.vlgmr.msra.gmra.mrb[0].mxu0 %v125_v33  ;;  %360 = vmatmul.mubr.bf16.vlgmr.msra.gmra.mrb[0].mxu1 %v125_v33 }
  0x6d   :  { %406 = vmatpush1.bf16.msra.mxu0 %v1948_v2  ;;  %437 = vmatprep.mubr.bf16.mxu0 %v1832_v0 }
  0x6e   :  { %407 = vmatprep.subr.bf16.mxu0 %v1951_v3  ;;  %447 = vmatpush1.bf16.msra.mxu1 %v1961_v7 }
  0x6f   :  { %448 = vmatprep.subr.bf16.mxu1 %v1971_v10  ;;  %478 = vmatprep.mubr.bf16.mxu1 %v1832_v0 }
  0x71   :  { %408 = vmatpush1.bf16.msra.mxu0 %v1954_v4 }
  0x72   :  { %409 = vmatprep.subr.bf16.mxu0 %v1957_v5  ;;  %449 = vmatpush1.bf16.msra.mxu1 %v1973_v11 }
  0x73   :  { %450 = vmatprep.subr.bf16.mxu1 %v1981_v14 }
  0x75   :  { %410 = vmatpush1.bf16.msra.mxu0 %v1964_v8 }
  0x76   :  { %411 = vmatprep.subr.bf16.mxu0 %v1968_v9  ;;  %451 = vmatpush1.bf16.msra.mxu1 %v1985_v15 }
  0x77   :  { %452 = vmatprep.subr.bf16.mxu1 %v1988_v16 }
  0x79   :  { %412 = vmatpush1.bf16.msra.mxu0 %v1977_v12 }
  0x7a   :  { %413 = vmatprep.subr.bf16.mxu0 %v1979_v13  ;;  %453 = vmatpush1.bf16.msra.mxu1 %v1997_v19 }
  0x7b   :  { %454 = vmatprep.subr.bf16.mxu1 %v2000_v20 }
  0x7d   :  { %414 = vmatpush1.bf16.msra.mxu0 %v1991_v17 }
  0x7e   :  { %415 = vmatprep.subr.bf16.mxu0 %v1994_v18  ;;  %455 = vmatpush1.bf16.msra.mxu1 %v2009_v23 }
  0x7f   :  { %456 = vmatprep.subr.bf16.mxu1 %v2012_v24 }
  0x81   :  { %416 = vmatpush1.bf16.msra.mxu0 %v2002_v21 }
  0x82   :  { %417 = vmatprep.subr.bf16.mxu0 %v2005_v22  ;;  %457 = vmatpush1.bf16.msra.mxu1 %v2021_v27 }
  0x83   :  { %458 = vmatprep.subr.bf16.mxu1 %v2024_v28 }
  0x85   :  { %418 = vmatpush1.bf16.msra.mxu0 %v2015_v25 }
  0x86   :  { %419 = vmatprep.subr.bf16.mxu0 %v2018_v26  ;;  %459 = vmatpush1.bf16.msra.mxu1 %v2031_v31 }
  0x87   :  { %460 = vmatprep.subr.bf16.mxu1 %v2034_v32 }
  0x89   :  { %420 = vmatpush1.bf16.msra.mxu0 %v2027_v29 }
  0x8a   :  { %525 = vmatprep.subr.bf16.mxu0 %v1946_v1  ;;  %461 = vmatpush1.bf16.msra.mxu1 %v2038_v34 }
  0x8b   :  { %566 = vmatprep.subr.bf16.mxu1 %v1959_v6 }
 0x13f   :  { %v320_v38 = vpop.f32.mrb[0].mxu0  ;;  %v361_v48 = vpop.f32.mrb[0].mxu1 }
 0x140   :  { %v368_v40 = vadd.f32 %v320_v38, %v121_v36  ;;  %v322_v41 = vpop.f32.mrb[1].mxu0  ;;  %v363_v49 = vpop.f32.mrb[1].mxu1  ;;  %v370_v55 = vadd.f32 %v361_v48, %v123_v52 }
 0x141   :  { %v369_v42 = vadd.f32 %v322_v41, %v122_v37  ;;  %v324_v43 = vpop.f32.mrb[2].mxu0  ;;  %v371_v50 = vadd.f32 %v363_v49, %v124_v46  ;;  %v365_v51 = vpop.f32.mrb[2].mxu1  ;;  %v399_v49 = vld [vmem:[#allocation5 + $0x18] sm:$0xff] }
 0x142   :  { %v1418_v44 = vmul.f32 -1.442695, %v368_v40  ;;  %v325_v45 = vpop.f32.mrb[3].mxu0  ;;  %v366_v53 = vpop.f32.mrb[3].mxu1  ;;  %v2084_v40 = vld [vmem:[%s2339_s4] ss:$0 sm:$0xff] }
 0x143   :  { %v1419_v47 = vmul.f32 -1.442695, %v369_v42  ;;  %v1420_v54 = vmul.f32 -1.442695, %v371_v50 }
 0x144   :  { %1501 = vpow2.f32 %v1418_v44  ;;  %v398_v44 = vld [vmem:[#allocation5 + $0x10] sm:$0xff] }
 0x145   :  { %1503 = vpow2.f32 %v1419_v47  ;;  %v400_v45 = vunpack.c.l.bf16 %v398_v44  ;;  %v401_v46 = vunpack.c.h.bf16 %v398_v44 }
 0x146   :  { %1505 = vpow2.f32 %v1420_v54 }
 0x147   :  { %1507 = vtanh.f32 %v370_v55 }
 0x14e   :  { %v1502_v56 = vpop.eup %1501 }
 0x14f   :  { %v1504_v57 = vpop.eup %1503  ;;  %v375_v58 = vadd.f32 1.0, %v1502_v56 }
 0x150   :  { %v381_v59 = vadd.f32 1.0, %v1504_v57  ;;  %v1506_v60 = vpop.eup %1505 }
 0x151   :  { %1509 = vrcp.f32 %v375_v58  ;;  %v1508_v61 = vpop.eup %1507  ;;  %v388_v30 = vadd.f32 1.0, %v1506_v60 }
 0x152   :  { %1511 = vrcp.f32 %v381_v59  ;;  %v403_v59 = vunpack.c.h.bf16 %v399_v49 }
 0x153   :  { %1513 = vrcp.f32 %v388_v30 }
 0x15b   :  { %v1510_v63 = vpop.eup %1509 }
 0x15c   :  { %v1512_v33 = vpop.eup %1511  ;;  %v392_v35 = vmul.f32 %v1510_v63, %v1508_v61 }
 0x15d   :  { %v391_v36 = vmul.f32 %v1512_v33, %v83_v62  ;;  %v1514_v38 = vpop.eup %1513  ;;  %v402_v62 = vunpack.c.l.bf16 %v399_v49 }
 0x15f   :  { %v2078_v37 = vadd.f32 %v392_v35, %v391_v36 }
 0x161   :  { %1515 = vtanh.f32 %v2078_v37 }
 0x16b   :  { %v1516_v39 = vpop.eup %1515 }
 0x16c   :  { %v395_v41 = vmul.f32 %v1516_v39, %v1514_v38 }
 0x16e   :  { %v1254_v42 = vmul.f32 %v2084_v40, %v395_v41  ;;  %v404_v43 = vpack.c.bf16 %v395_v41, %v395_v41 }
 0x170   :  { %1262 = vadd.xlane.f32.xlu0 %v1254_v42  ;;  %438 = vmatmul.mubr.bf16.vlgmr.msra.gmra.mrb[4].mxu0 %v404_v43 }
 0x171   :  { %479 = vmatmul.mubr.bf16.vlgmr.msra.gmra.mrb[4].mxu1 %v404_v43  ;;  %526 = vmatpush1.bf16.msra.mxu0 %v1948_v2 }
 0x172   :  { %567 = vmatpush1.bf16.msra.mxu1 %v1961_v7  ;;  %527 = vmatprep.subr.bf16.mxu0 %v1951_v3 }
 0x173   :  { %568 = vmatprep.subr.bf16.mxu1 %v1971_v10  ;;  %557 = vmatprep.mubr.bf16.mxu0 %v1832_v0 }
 0x174   :  { %598 = vmatprep.mubr.bf16.mxu1 %v1832_v0 }
 0x175   :  { %528 = vmatpush1.bf16.msra.mxu0 %v1954_v4 }
 0x176   :  { %569 = vmatpush1.bf16.msra.mxu1 %v1973_v11  ;;  %529 = vmatprep.subr.bf16.mxu0 %v1957_v5 }
 0x177   :  { %570 = vmatprep.subr.bf16.mxu1 %v1981_v14 }
 0x179   :  { %530 = vmatpush1.bf16.msra.mxu0 %v1964_v8 }
 0x17a   :  { %571 = vmatpush1.bf16.msra.mxu1 %v1985_v15  ;;  %531 = vmatprep.subr.bf16.mxu0 %v1968_v9 }
 0x17b   :  { %572 = vmatprep.subr.bf16.mxu1 %v1988_v16 }
 0x17d   :  { %532 = vmatpush1.bf16.msra.mxu0 %v1977_v12 }
 0x17e   :  { %573 = vmatpush1.bf16.msra.mxu1 %v1997_v19  ;;  %533 = vmatprep.subr.bf16.mxu0 %v1979_v13 }
 0x17f   :  { %574 = vmatprep.subr.bf16.mxu1 %v2000_v20 }
 0x181   :  { %534 = vmatpush1.bf16.msra.mxu0 %v1991_v17 }
 0x182   :  { %575 = vmatpush1.bf16.msra.mxu1 %v2009_v23  ;;  %535 = vmatprep.subr.bf16.mxu0 %v1994_v18 }
 0x183   :  { %576 = vmatprep.subr.bf16.mxu1 %v2012_v24 }
 0x185   :  { %536 = vmatpush1.bf16.msra.mxu0 %v2002_v21 }
 0x186   :  { %577 = vmatpush1.bf16.msra.mxu1 %v2021_v27  ;;  %537 = vmatprep.subr.bf16.mxu0 %v2005_v22 }
 0x187   :  { %578 = vmatprep.subr.bf16.mxu1 %v2024_v28 }
 0x189   :  { %538 = vmatpush1.bf16.msra.mxu0 %v2015_v25 }
 0x18a   :  { %579 = vmatpush1.bf16.msra.mxu1 %v2031_v31  ;;  %539 = vmatprep.subr.bf16.mxu0 %v2018_v26 }
 0x18b   :  { %580 = vmatprep.subr.bf16.mxu1 %v2034_v32 }
 0x18d   :  { %540 = vmatpush1.bf16.msra.mxu0 %v2027_v29 }
 0x18e   :  { %581 = vmatpush1.bf16.msra.mxu1 %v2038_v34  ;;  %645 = vmatprep.subr.bf16.mxu0 %v1946_v1 }
 0x18f   :  { %686 = vmatprep.subr.bf16.mxu1 %v1959_v6 }
 0x243   :  { %v439_v47 = vpop.f32.mrb[4].mxu0 }
 0x244   :  { %v487_v48 = vadd.f32 %v439_v47, %v400_v45  ;;  %v480_v50 = vpop.f32.mrb[4].mxu1  ;;  %v441_v51 = vpop.f32.mrb[5].mxu0 }
 0x245   :  { %v488_v52 = vadd.f32 %v441_v51, %v401_v46  ;;  %v482_v53 = vpop.f32.mrb[5].mxu1  ;;  %v443_v54 = vpop.f32.mrb[6].mxu0  ;;  %v489_v30 = vadd.f32 %v480_v50, %v402_v62 }
 0x246   :  { %v1421_v55 = vmul.f32 -1.442695, %v487_v48  ;;  %v484_v56 = vpop.f32.mrb[6].mxu1  ;;  %v444_v57 = vpop.f32.mrb[7].mxu0  ;;  %v490_v61 = vadd.f32 %v482_v53, %v403_v59 }
 0x247   :  { %v1422_v58 = vmul.f32 -1.442695, %v488_v52  ;;  %v485_v60 = vpop.f32.mrb[7].mxu1  ;;  %v519_v57 = vld [vmem:[#allocation5 + $0x28] sm:$0xff] }
 0x248   :  { %1517 = vpow2.f32 %v1421_v55  ;;  %v1423_v63 = vmul.f32 -1.442695, %v490_v61 }
 0x249   :  { %1519 = vpow2.f32 %v1422_v58 }
 0x24a   :  { %1521 = vpow2.f32 %v1423_v63 }
 0x24b   :  { %1523 = vtanh.f32 %v489_v30 }
 0x252   :  { %v1518_v33 = vpop.eup %1517 }
 0x253   :  { %v1520_v35 = vpop.eup %1519  ;;  %v494_v36 = vadd.f32 1.0, %v1518_v33 }
 0x254   :  { %v500_v38 = vadd.f32 1.0, %v1520_v35  ;;  %v1522_v39 = vpop.eup %1521 }
 0x255   :  { %1525 = vrcp.f32 %v494_v36  ;;  %v1524_v41 = vpop.eup %1523  ;;  %v507_v45 = vadd.f32 1.0, %v1522_v39  ;;  %v523_v36 = vunpack.c.h.bf16 %v519_v57 }
 0x256   :  { %1527 = vrcp.f32 %v500_v38 }
 0x257   :  { %1529 = vrcp.f32 %v507_v45 }
 0x25f   :  { %v1526_v42 = vpop.eup %1525 }
 0x260   :  { %v1528_v43 = vpop.eup %1527  ;;  %v511_v44 = vmul.f32 %v1526_v42, %v1524_v41  ;;  %v522_v41 = vunpack.c.l.bf16 %v519_v57 }
 0x261   :  { %v510_v46 = vmul.f32 %v1528_v43, %v2078_v37  ;;  %v1530_v48 = vpop.eup %1529  ;;  %v518_v37 = vld [vmem:[#allocation5 + $0x20] sm:$0xff] }
 0x262   :  { %v520_v53 = vunpack.c.l.bf16 %v518_v37  ;;  %v521_v54 = vunpack.c.h.bf16 %v518_v37 }
 0x263   :  { %v2122_v47 = vadd.f32 %v511_v44, %v510_v46 }
 0x265   :  { %1531 = vtanh.f32 %v2122_v47 }
 0x26f   :  { %v1532_v49 = vpop.eup %1531 }
 0x270   :  { %v514_v50 = vmul.f32 %v1532_v49, %v1530_v48 }
 0x272   :  { %v1255_v51 = vmul.f32 %v2084_v40, %v514_v50  ;;  %v524_v52 = vpack.c.bf16 %v514_v50, %v514_v50 }
 0x274   :  { %1264 = vadd.xlane.f32.xlu0 %v1255_v51  ;;  %558 = vmatmul.mubr.bf16.vlgmr.msra.gmra.mrb[8].mxu0 %v524_v52 }
 0x275   :  { %599 = vmatmul.mubr.bf16.vlgmr.msra.gmra.mrb[8].mxu1 %v524_v52  ;;  %646 = vmatpush1.bf16.msra.mxu0 %v1948_v2 }
 0x276   :  { %687 = vmatpush1.bf16.msra.mxu1 %v1961_v7  ;;  %647 = vmatprep.subr.bf16.mxu0 %v1951_v3 }
 0x277   :  { %688 = vmatprep.subr.bf16.mxu1 %v1971_v10  ;;  %677 = vmatprep.mubr.bf16.mxu0 %v1832_v0 }
 0x278   :  { %718 = vmatprep.mubr.bf16.mxu1 %v1832_v0 }
 0x279   :  { %648 = vmatpush1.bf16.msra.mxu0 %v1954_v4 }
 0x27a   :  { %689 = vmatpush1.bf16.msra.mxu1 %v1973_v11  ;;  %649 = vmatprep.subr.bf16.mxu0 %v1957_v5 }
 0x27b   :  { %690 = vmatprep.subr.bf16.mxu1 %v1981_v14 }
 0x27d   :  { %650 = vmatpush1.bf16.msra.mxu0 %v1964_v8 }
 0x27e   :  { %691 = vmatpush1.bf16.msra.mxu1 %v1985_v15  ;;  %651 = vmatprep.subr.bf16.mxu0 %v1968_v9 }
 0x27f   :  { %692 = vmatprep.subr.bf16.mxu1 %v1988_v16 }
 0x281   :  { %652 = vmatpush1.bf16.msra.mxu0 %v1977_v12 }
 0x282   :  { %693 = vmatpush1.bf16.msra.mxu1 %v1997_v19  ;;  %653 = vmatprep.subr.bf16.mxu0 %v1979_v13 }
 0x283   :  { %694 = vmatprep.subr.bf16.mxu1 %v2000_v20 }
 0x285   :  { %654 = vmatpush1.bf16.msra.mxu0 %v1991_v17 }
 0x286   :  { %695 = vmatpush1.bf16.msra.mxu1 %v2009_v23  ;;  %655 = vmatprep.subr.bf16.mxu0 %v1994_v18 }
 0x287   :  { %696 = vmatprep.subr.bf16.mxu1 %v2012_v24 }
 0x289   :  { %656 = vmatpush1.bf16.msra.mxu0 %v2002_v21 }
 0x28a   :  { %697 = vmatpush1.bf16.msra.mxu1 %v2021_v27  ;;  %657 = vmatprep.subr.bf16.mxu0 %v2005_v22 }
 0x28b   :  { %698 = vmatprep.subr.bf16.mxu1 %v2024_v28 }
 0x28d   :  { %658 = vmatpush1.bf16.msra.mxu0 %v2015_v25 }
 0x28e   :  { %699 = vmatpush1.bf16.msra.mxu1 %v2031_v31  ;;  %659 = vmatprep.subr.bf16.mxu0 %v2018_v26 }
 0x28f   :  { %700 = vmatprep.subr.bf16.mxu1 %v2034_v32 }
 0x291   :  { %660 = vmatpush1.bf16.msra.mxu0 %v2027_v29 }
 0x292   :  { %701 = vmatpush1.bf16.msra.mxu1 %v2038_v34  ;;  %765 = vmatprep.subr.bf16.mxu0 %v1946_v1 }
 0x293   :  { %806 = vmatprep.subr.bf16.mxu1 %v1959_v6 }
 0x347   :  { %v559_v55 = vpop.f32.mrb[8].mxu0 }
 0x348   :  { %v607_v56 = vadd.f32 %v559_v55, %v520_v53  ;;  %v600_v58 = vpop.f32.mrb[8].mxu1  ;;  %v561_v59 = vpop.f32.mrb[9].mxu0 }
 0x349   :  { %v608_v60 = vadd.f32 %v561_v59, %v521_v54  ;;  %v602_v61 = vpop.f32.mrb[9].mxu1  ;;  %v563_v62 = vpop.f32.mrb[10].mxu0  ;;  %v609_v43 = vadd.f32 %v600_v58, %v522_v41 }
 0x34a   :  { %v1424_v63 = vmul.f32 -1.442695, %v607_v56  ;;  %v604_v30 = vpop.f32.mrb[10].mxu1  ;;  %v564_v33 = vpop.f32.mrb[11].mxu0  ;;  %v610_v39 = vadd.f32 %v602_v61, %v523_v36 }
 0x34b   :  { %v1425_v35 = vmul.f32 -1.442695, %v608_v60  ;;  %v605_v38 = vpop.f32.mrb[11].mxu1  ;;  %v639_v33 = vld [vmem:[#allocation5 + $0x38] sm:$0xff] }
 0x34c   :  { %1533 = vpow2.f32 %v1424_v63  ;;  %v1426_v42 = vmul.f32 -1.442695, %v610_v39 }
 0x34d   :  { %1535 = vpow2.f32 %v1425_v35 }
 0x34e   :  { %1537 = vpow2.f32 %v1426_v42 }
 0x34f   :  { %1539 = vtanh.f32 %v609_v43 }
 0x356   :  { %v1534_v44 = vpop.eup %1533 }
 0x357   :  { %v1536_v45 = vpop.eup %1535  ;;  %v614_v46 = vadd.f32 1.0, %v1534_v44 }
 0x358   :  { %v620_v48 = vadd.f32 1.0, %v1536_v45  ;;  %v1538_v49 = vpop.eup %1537 }
 0x359   :  { %1541 = vrcp.f32 %v614_v46  ;;  %v1540_v50 = vpop.eup %1539  ;;  %v627_v53 = vadd.f32 1.0, %v1538_v49  ;;  %v643_v46 = vunpack.c.h.bf16 %v639_v33 }
 0x35a   :  { %1543 = vrcp.f32 %v620_v48 }
 0x35b   :  { %1545 = vrcp.f32 %v627_v53 }
 0x363   :  { %v1542_v51 = vpop.eup %1541 }
 0x364   :  { %v1544_v52 = vpop.eup %1543  ;;  %v631_v37 = vmul.f32 %v1542_v51, %v1540_v50  ;;  %v642_v50 = vunpack.c.l.bf16 %v639_v33 }
 0x365   :  { %v630_v54 = vmul.f32 %v1544_v52, %v2122_v47  ;;  %v1546_v56 = vpop.eup %1545  ;;  %v638_v47 = vld [vmem:[#allocation5 + $0x30] sm:$0xff] }
 0x366   :  { %v640_v61 = vunpack.c.l.bf16 %v638_v47  ;;  %v641_v62 = vunpack.c.h.bf16 %v638_v47 }
 0x367   :  { %v2161_v55 = vadd.f32 %v631_v37, %v630_v54 }
 0x369   :  { %1547 = vtanh.f32 %v2161_v55 }
 0x373   :  { %v1548_v57 = vpop.eup %1547 }
 0x374   :  { %v634_v58 = vmul.f32 %v1548_v57, %v1546_v56 }
 0x376   :  { %v1256_v59 = vmul.f32 %v2084_v40, %v634_v58  ;;  %v644_v60 = vpack.c.bf16 %v634_v58, %v634_v58 }
 0x378   :  { %1266 = vadd.xlane.f32.xlu1 %v1256_v59  ;;  %678 = vmatmul.mubr.bf16.vlgmr.msra.gmra.mrb[12].mxu0 %v644_v60 }
 0x379   :  { %719 = vmatmul.mubr.bf16.vlgmr.msra.gmra.mrb[12].mxu1 %v644_v60  ;;  %766 = vmatpush1.bf16.msra.mxu0 %v1948_v2 }
 0x37a   :  { %807 = vmatpush1.bf16.msra.mxu1 %v1961_v7  ;;  %767 = vmatprep.subr.bf16.mxu0 %v1951_v3 }
 0x37b   :  { %808 = vmatprep.subr.bf16.mxu1 %v1971_v10  ;;  %797 = vmatprep.mubr.bf16.mxu0 %v1832_v0 }
 0x37c   :  { %838 = vmatprep.mubr.bf16.mxu1 %v1832_v0 }
 0x37d   :  { %768 = vmatpush1.bf16.msra.mxu0 %v1954_v4 }
 0x37e   :  { %809 = vmatpush1.bf16.msra.mxu1 %v1973_v11  ;;  %769 = vmatprep.subr.bf16.mxu0 %v1957_v5 }
 0x37f   :  { %810 = vmatprep.subr.bf16.mxu1 %v1981_v14 }
 0x381   :  { %770 = vmatpush1.bf16.msra.mxu0 %v1964_v8 }
 0x382   :  { %811 = vmatpush1.bf16.msra.mxu1 %v1985_v15  ;;  %771 = vmatprep.subr.bf16.mxu0 %v1968_v9 }
 0x383   :  { %812 = vmatprep.subr.bf16.mxu1 %v1988_v16 }
 0x385   :  { %772 = vmatpush1.bf16.msra.mxu0 %v1977_v12 }
 0x386   :  { %813 = vmatpush1.bf16.msra.mxu1 %v1997_v19  ;;  %773 = vmatprep.subr.bf16.mxu0 %v1979_v13 }
 0x387   :  { %814 = vmatprep.subr.bf16.mxu1 %v2000_v20 }
 0x389   :  { %774 = vmatpush1.bf16.msra.mxu0 %v1991_v17 }
 0x38a   :  { %815 = vmatpush1.bf16.msra.mxu1 %v2009_v23  ;;  %775 = vmatprep.subr.bf16.mxu0 %v1994_v18 }
 0x38b   :  { %816 = vmatprep.subr.bf16.mxu1 %v2012_v24 }
 0x38d   :  { %776 = vmatpush1.bf16.msra.mxu0 %v2002_v21 }
 0x38e   :  { %817 = vmatpush1.bf16.msra.mxu1 %v2021_v27  ;;  %777 = vmatprep.subr.bf16.mxu0 %v2005_v22 }
 0x38f   :  { %818 = vmatprep.subr.bf16.mxu1 %v2024_v28 }
 0x391   :  { %778 = vmatpush1.bf16.msra.mxu0 %v2015_v25 }
 0x392   :  { %819 = vmatpush1.bf16.msra.mxu1 %v2031_v31  ;;  %779 = vmatprep.subr.bf16.mxu0 %v2018_v26 }
 0x393   :  { %820 = vmatprep.subr.bf16.mxu1 %v2034_v32 }
 0x395   :  { %780 = vmatpush1.bf16.msra.mxu0 %v2027_v29 }
 0x396   :  { %821 = vmatpush1.bf16.msra.mxu1 %v2038_v34  ;;  %885 = vmatprep.subr.bf16.mxu0 %v1946_v1 }
 0x397   :  { %926 = vmatprep.subr.bf16.mxu1 %v1959_v6 }
 0x44b   :  { %v679_v63 = vpop.f32.mrb[12].mxu0 }
 0x44c   :  { %v727_v30 = vadd.f32 %v679_v63, %v640_v61  ;;  %v720_v35 = vpop.f32.mrb[12].mxu1  ;;  %v681_v36 = vpop.f32.mrb[13].mxu0 }
 0x44d   :  { %v728_v38 = vadd.f32 %v681_v36, %v641_v62  ;;  %v722_v39 = vpop.f32.mrb[13].mxu1  ;;  %v683_v41 = vpop.f32.mrb[14].mxu0  ;;  %v729_v52 = vadd.f32 %v720_v35, %v642_v50 }
 0x44e   :  { %v1427_v42 = vmul.f32 -1.442695, %v727_v30  ;;  %v724_v43 = vpop.f32.mrb[14].mxu1  ;;  %v684_v44 = vpop.f32.mrb[15].mxu0  ;;  %v730_v49 = vadd.f32 %v722_v39, %v643_v46  ;;  %v759_v39 = vld [vmem:[#allocation5 + $0x48] sm:$0xff] }
 0x44f   :  { %v1428_v45 = vmul.f32 -1.442695, %v728_v38  ;;  %v725_v48 = vpop.f32.mrb[15].mxu1 }
 0x450   :  { %1549 = vpow2.f32 %v1427_v42  ;;  %v1429_v51 = vmul.f32 -1.442695, %v730_v49 }
 0x451   :  { %1551 = vpow2.f32 %v1428_v45 }
 0x452   :  { %1553 = vpow2.f32 %v1429_v51  ;;  %v763_v51 = vunpack.c.h.bf16 %v759_v39 }
 0x453   :  { %1555 = vtanh.f32 %v729_v52 }
 0x45a   :  { %v1550_v37 = vpop.eup %1549 }
 0x45b   :  { %v1552_v53 = vpop.eup %1551  ;;  %v734_v54 = vadd.f32 1.0, %v1550_v37 }
 0x45c   :  { %v740_v56 = vadd.f32 1.0, %v1552_v53  ;;  %v1554_v57 = vpop.eup %1553 }
 0x45d   :  { %1557 = vrcp.f32 %v734_v54  ;;  %v1556_v58 = vpop.eup %1555  ;;  %v747_v61 = vadd.f32 1.0, %v1554_v57 }
 0x45e   :  { %1559 = vrcp.f32 %v740_v56 }
 0x45f   :  { %1561 = vrcp.f32 %v747_v61 }
 0x467   :  { %v1558_v59 = vpop.eup %1557 }
 0x468   :  { %v1560_v60 = vpop.eup %1559  ;;  %v751_v47 = vmul.f32 %v1558_v59, %v1556_v58 }
 0x469   :  { %v750_v62 = vmul.f32 %v1560_v60, %v2161_v55  ;;  %v1562_v30 = vpop.eup %1561 }
 0x46b   :  { %v2200_v63 = vadd.f32 %v751_v47, %v750_v62 }
 0x46d   :  { %1563 = vtanh.f32 %v2200_v63 }
 0x477   :  { %v1564_v33 = vpop.eup %1563 }
 0x478   :  { %v754_v35 = vmul.f32 %v1564_v33, %v1562_v30 }
 0x47a   :  { %v1257_v36 = vmul.f32 %v2084_v40, %v754_v35  ;;  %v764_v38 = vpack.c.bf16 %v754_v35, %v754_v35 }
 0x47c   :  { %1268 = vadd.xlane.f32.xlu1 %v1257_v36  ;;  %798 = vmatmul.mubr.bf16.vlgmr.msra.gmra.mrb[16].mxu0 %v764_v38 }
 0x47d   :  { %839 = vmatmul.mubr.bf16.vlgmr.msra.gmra.mrb[16].mxu1 %v764_v38  ;;  %886 = vmatpush1.bf16.msra.mxu0 %v1948_v2  ;;  %v758_v2 = vld [vmem:[#allocation5 + $0x40] sm:$0xff] }
 0x47e   :  { %927 = vmatpush1.bf16.msra.mxu1 %v1961_v7  ;;  %887 = vmatprep.subr.bf16.mxu0 %v1951_v3  ;;  %v760_v3 = vunpack.c.l.bf16 %v758_v2 }
 0x47f   :  { %928 = vmatprep.subr.bf16.mxu1 %v1971_v10  ;;  %917 = vmatprep.mubr.bf16.mxu0 %v1832_v0 }
 0x480   :  { %958 = vmatprep.mubr.bf16.mxu1 %v1832_v0 }
 0x481   :  { %888 = vmatpush1.bf16.msra.mxu0 %v1954_v4  ;;  %v761_v4 = vunpack.c.h.bf16 %v758_v2 }
 0x482   :  { %929 = vmatpush1.bf16.msra.mxu1 %v1973_v11  ;;  %889 = vmatprep.subr.bf16.mxu0 %v1957_v5 }
 0x483   :  { %930 = vmatprep.subr.bf16.mxu1 %v1981_v14 }
 0x485   :  { %890 = vmatpush1.bf16.msra.mxu0 %v1964_v8 }
 0x486   :  { %931 = vmatpush1.bf16.msra.mxu1 %v1985_v15  ;;  %891 = vmatprep.subr.bf16.mxu0 %v1968_v9 }
 0x487   :  { %932 = vmatprep.subr.bf16.mxu1 %v1988_v16 }
 0x489   :  { %892 = vmatpush1.bf16.msra.mxu0 %v1977_v12 }
 0x48a   :  { %933 = vmatpush1.bf16.msra.mxu1 %v1997_v19  ;;  %893 = vmatprep.subr.bf16.mxu0 %v1979_v13 }
 0x48b   :  { %934 = vmatprep.subr.bf16.mxu1 %v2000_v20 }
 0x48d   :  { %894 = vmatpush1.bf16.msra.mxu0 %v1991_v17 }
 0x48e   :  { %935 = vmatpush1.bf16.msra.mxu1 %v2009_v23  ;;  %895 = vmatprep.subr.bf16.mxu0 %v1994_v18 }
 0x48f   :  { %936 = vmatprep.subr.bf16.mxu1 %v2012_v24 }
 0x491   :  { %896 = vmatpush1.bf16.msra.mxu0 %v2002_v21 }
 0x492   :  { %937 = vmatpush1.bf16.msra.mxu1 %v2021_v27  ;;  %897 = vmatprep.subr.bf16.mxu0 %v2005_v22 }
 0x493   :  { %938 = vmatprep.subr.bf16.mxu1 %v2024_v28 }
 0x495   :  { %898 = vmatpush1.bf16.msra.mxu0 %v2015_v25 }
 0x496   :  { %939 = vmatpush1.bf16.msra.mxu1 %v2031_v31  ;;  %899 = vmatprep.subr.bf16.mxu0 %v2018_v26 }
 0x497   :  { %940 = vmatprep.subr.bf16.mxu1 %v2034_v32 }
 0x499   :  { %900 = vmatpush1.bf16.msra.mxu0 %v2027_v29 }
 0x49a   :  { %941 = vmatpush1.bf16.msra.mxu1 %v2038_v34  ;;  %1005 = vmatprep.subr.bf16.mxu0 %v1946_v1 }
 0x49b   :  { %1046 = vmatprep.subr.bf16.mxu1 %v1959_v6  ;;  %v762_v6 = vunpack.c.l.bf16 %v759_v39  ;;  %v2257_v39 = vld [vmem:[#allocation11 + $0x44] ss:$16 sps:$4 sm:$0xff]  }
 0x54f   :  { %v799_v5 = vpop.f32.mrb[16].mxu0 }
 0x550   :  { %v847_v55 = vadd.f32 %v799_v5, %v760_v3  ;;  %v840_v41 = vpop.f32.mrb[16].mxu1  ;;  %v801_v42 = vpop.f32.mrb[17].mxu0  ;;  %v2243_v5 = vld [vmem:[#allocation11] ss:$16 sps:$4 sm:$0xff]  }
 0x551   :  { %v848_v43 = vadd.f32 %v801_v42, %v761_v4  ;;  %v842_v44 = vpop.f32.mrb[17].mxu1  ;;  %v803_v45 = vpop.f32.mrb[18].mxu0  ;;  %v849_v53 = vadd.f32 %v840_v41, %v762_v6 }
 0x552   :  { %v1430_v46 = vmul.f32 -1.442695, %v847_v55  ;;  %v844_v48 = vpop.f32.mrb[18].mxu1  ;;  %v804_v49 = vpop.f32.mrb[19].mxu0  ;;  %v850_v1 = vadd.f32 %v842_v44, %v763_v51  ;;  %v2253_v55 = vld [vmem:[#allocation11 + $0x20] ss:$16 sps:$4 sm:$0xff]  }
 0x553   :  { %v1431_v50 = vmul.f32 -1.442695, %v848_v43  ;;  %v845_v52 = vpop.f32.mrb[19].mxu1 }
 0x554   :  { %1565 = vpow2.f32 %v1430_v46  ;;  %v1432_v37 = vmul.f32 -1.442695, %v850_v1 }
 0x555   :  { %1567 = vpow2.f32 %v1431_v50 }
 0x556   :  { %1569 = vpow2.f32 %v1432_v37 }
 0x557   :  { %1571 = vtanh.f32 %v849_v53  ;;  %v1635_v53 = vld [vmem:[#allocation11 + $0x8] ss:$16 sps:$4 sm:$0xff]  }
 0x55e   :  { %v1566_v54 = vpop.eup %1565 }
 0x55f   :  { %v1568_v56 = vpop.eup %1567  ;;  %v854_v57 = vadd.f32 1.0, %v1566_v54  ;;  %v1636_v54 = vld [vmem:[#allocation11 + $0x2c] ss:$16 sps:$4 sm:$0xff]  }
 0x560   :  { %v860_v58 = vadd.f32 1.0, %v1568_v56  ;;  %v1570_v59 = vpop.eup %1569  ;;  %v1637_v56 = vld [vmem:[#allocation11 + $0x28] ss:$16 sps:$4 sm:$0xff]  }
 0x561   :  { %1573 = vrcp.f32 %v854_v57  ;;  %v1572_v60 = vpop.eup %1571  ;;  %v867_v30 = vadd.f32 1.0, %v1570_v59  ;;  %v1638_v57 = vld [vmem:[#allocation11 + $0x4c] ss:$16 sps:$4 sm:$0xff]   ;;  %v1640_v59 = vld [vmem:[#allocation11 + $0x48] ss:$16 sps:$4 sm:$0xff]  }
 0x562   :  { %1575 = vrcp.f32 %v860_v58  ;;  %v1639_v58 = vld [vmem:[#allocation11 + $0x40] ss:$16 sps:$4 sm:$0xff]  }
 0x563   :  { %1577 = vrcp.f32 %v867_v30  ;;  %v1646_v30 = vld [vmem:[#allocation11 + $0x8c] ss:$16 sps:$4 sm:$0xff]  }
 0x56b   :  { %v1574_v47 = vpop.eup %1573 }
 0x56c   :  { %v1576_v61 = vpop.eup %1575  ;;  %v871_v62 = vmul.f32 %v1574_v47, %v1572_v60  ;;  %v1641_v60 = vld [vmem:[#allocation11 + $0x64] ss:$16 sps:$4 sm:$0xff]   ;;  %v1642_v47 = vld [vmem:[#allocation11 + $0x6c] ss:$16 sps:$4 sm:$0xff]  }
 0x56d   :  { %v870_v33 = vmul.f32 %v1576_v61, %v2200_v63  ;;  %v1578_v36 = vpop.eup %1577  ;;  %v2247_v63 = vld [vmem:[#allocation11 + $0x24] ss:$16 sps:$4 sm:$0xff]   ;;  %v1643_v61 = vld [vmem:[#allocation11 + $0x60] ss:$16 sps:$4 sm:$0xff]  }
 0x56f   :  { %v2239_v35 = vadd.f32 %v871_v62, %v870_v33  ;;  %v1644_v62 = vld [vmem:[#allocation11 + $0x68] ss:$16 sps:$4 sm:$0xff]   ;;  %v1647_v33 = vld [vmem:[#allocation11 + $0x80] ss:$16 sps:$4 sm:$0xff]  }
 0x571   :  { %1579 = vtanh.f32 %v2239_v35 }
 0x57b   :  { %v1580_v38 = vpop.eup %1579 }
 0x57c   :  { %v874_v2 = vmul.f32 %v1580_v38, %v1578_v36  ;;  %v1649_v36 = vld [vmem:[#allocation11 + $0xa4] ss:$16 sps:$4 sm:$0xff]   ;;  %v1650_v38 = vld [vmem:[#allocation11 + $0xac] ss:$16 sps:$4 sm:$0xff]  }
 0x57e   :  { %v1258_v3 = vmul.f32 %v2084_v40, %v874_v2  ;;  %v884_v4 = vpack.c.bf16 %v874_v2, %v874_v2  ;;  %v1651_v2 = vld [vmem:[#allocation11 + $0xa0] ss:$16 sps:$4 sm:$0xff]  }
 0x580   :  { %1270 = vadd.xlane.f32.xlu0 %v1258_v3  ;;  %918 = vmatmul.mubr.bf16.vlgmr.msra.gmra.mrb[20].mxu0 %v884_v4  ;;  %v1652_v3 = vld [vmem:[#allocation11 + $0xa8] ss:$16 sps:$4 sm:$0xff]  }
 0x581   :  { %959 = vmatmul.mubr.bf16.vlgmr.msra.gmra.mrb[20].mxu1 %v884_v4  ;;  %1006 = vmatpush1.bf16.msra.mxu0 %v2243_v5  ;;  %v1653_v4 = vld [vmem:[#allocation11 + $0xc4] ss:$16 sps:$4 sm:$0xff]  }
 0x582   :  { %1047 = vmatpush1.bf16.msra.mxu1 %v1961_v7  ;;  %1007 = vmatprep.subr.bf16.mxu0 %v2247_v63  ;;  %v1633_v7 = vld [vmem:[#allocation11 + $0x4] ss:$16 sps:$4 sm:$0xff]  }
 0x583   :  { %1048 = vmatprep.subr.bf16.mxu1 %v1971_v10  ;;  %1037 = vmatprep.mubr.bf16.mxu0 %v1832_v0 }
 0x584   :  { %1078 = vmatprep.mubr.bf16.mxu1 %v1832_v0 }
 0x585   :  { %1008 = vmatpush1.bf16.msra.mxu0 %v2253_v55 }
 0x586   :  { %1049 = vmatpush1.bf16.msra.mxu1 %v1973_v11  ;;  %1009 = vmatprep.subr.bf16.mxu0 %v2257_v39 }
 0x587   :  { %1050 = vmatprep.subr.bf16.mxu1 %v1981_v14  ;;  %v879_v14 = vld [vmem:[#allocation5 + $0x58] sm:$0xff] }
 0x589   :  { %1010 = vmatpush1.bf16.msra.mxu0 %v1964_v8  ;;  %v1634_v8 = vld [vmem:[#allocation11 + $0xc] ss:$16 sps:$4 sm:$0xff]  }
 0x58a   :  { %1051 = vmatpush1.bf16.msra.mxu1 %v1985_v15  ;;  %1011 = vmatprep.subr.bf16.mxu0 %v1968_v9  ;;  %v878_v9 = vld [vmem:[#allocation5 + $0x50] sm:$0xff] }
 0x58b   :  { %1052 = vmatprep.subr.bf16.mxu1 %v1988_v16  ;;  %v880_v10 = vunpack.c.l.bf16 %v878_v9  ;;  %v881_v11 = vunpack.c.h.bf16 %v878_v9  ;;  %v1660_v9 = vld [vmem:[#allocation11 + $0xe8] ss:$16 sps:$4 sm:$0xff]  }
 0x58d   :  { %1012 = vmatpush1.bf16.msra.mxu0 %v1977_v12 }
 0x58e   :  { %1053 = vmatpush1.bf16.msra.mxu1 %v1997_v19  ;;  %1013 = vmatprep.subr.bf16.mxu0 %v1979_v13 }
 0x58f   :  { %1054 = vmatprep.subr.bf16.mxu1 %v2000_v20 }
 0x591   :  { %1014 = vmatpush1.bf16.msra.mxu0 %v1991_v17 }
 0x592   :  { %1055 = vmatpush1.bf16.msra.mxu1 %v2009_v23  ;;  %1015 = vmatprep.subr.bf16.mxu0 %v1994_v18 }
 0x593   :  { %1056 = vmatprep.subr.bf16.mxu1 %v2012_v24  ;;  %v883_v24 = vunpack.c.h.bf16 %v879_v14 }
 0x595   :  { %1016 = vmatpush1.bf16.msra.mxu0 %v2002_v21 }
 0x596   :  { %1057 = vmatpush1.bf16.msra.mxu1 %v2021_v27  ;;  %1017 = vmatprep.subr.bf16.mxu0 %v2005_v22  ;;  %v882_v27 = vunpack.c.l.bf16 %v879_v14 }
 0x597   :  { %1058 = vmatprep.subr.bf16.mxu1 %v2024_v28 }
 0x599   :  { %1018 = vmatpush1.bf16.msra.mxu0 %v2015_v25 }
 0x59a   :  { %1059 = vmatpush1.bf16.msra.mxu1 %v2031_v31  ;;  %1019 = vmatprep.subr.bf16.mxu0 %v2018_v26 }
 0x59b   :  { %1060 = vmatprep.subr.bf16.mxu1 %v2034_v32 }
 0x59d   :  { %1020 = vmatpush1.bf16.msra.mxu0 %v2027_v29 }
 0x59e   :  { %1061 = vmatpush1.bf16.msra.mxu1 %v2038_v34  ;;  %1125 = vmatprep.subr.bf16.mxu0 %v1633_v7  ;;  %v1658_v7 = vld [vmem:[#allocation11 + $0xec] ss:$16 sps:$4 sm:$0xff]  }
 0x59f   :  { %1166 = vmatprep.subr.bf16.mxu1 %v1634_v8  ;;  %v1659_v8 = vld [vmem:[#allocation11 + $0xe0] ss:$16 sps:$4 sm:$0xff]  }
 0x653   :  { %v919_v12 = vpop.f32.mrb[20].mxu0 }
 0x654   :  { %v967_v13 = vadd.f32 %v919_v12, %v880_v10  ;;  %v960_v15 = vpop.f32.mrb[20].mxu1  ;;  %v921_v16 = vpop.f32.mrb[21].mxu0  ;;  %v998_v10 = vld [vmem:[#allocation5 + $0x60] sm:$0xff] }
 0x655   :  { %v968_v17 = vadd.f32 %v921_v16, %v881_v11  ;;  %v962_v18 = vpop.f32.mrb[21].mxu1  ;;  %v923_v19 = vpop.f32.mrb[22].mxu0  ;;  %v969_v29 = vadd.f32 %v960_v15, %v882_v27  ;;  %v1000_v11 = vunpack.c.l.bf16 %v998_v10  ;;  %v1001_v12 = vunpack.c.h.bf16 %v998_v10  ;;  %v999_v15 = vld [vmem:[#allocation5 + $0x68] sm:$0xff] }
 0x656   :  { %v1433_v20 = vmul.f32 -1.442695, %v967_v13  ;;  %v964_v21 = vpop.f32.mrb[22].mxu1  ;;  %v924_v22 = vpop.f32.mrb[23].mxu0  ;;  %v970_v26 = vadd.f32 %v962_v18, %v883_v24 }
 0x657   :  { %v1434_v23 = vmul.f32 -1.442695, %v968_v17  ;;  %v965_v25 = vpop.f32.mrb[23].mxu1 }
 0x658   :  { %1581 = vpow2.f32 %v1433_v20  ;;  %v1435_v28 = vmul.f32 -1.442695, %v970_v26  ;;  %v1003_v25 = vunpack.c.h.bf16 %v999_v15 }
 0x659   :  { %1583 = vpow2.f32 %v1434_v23 }
 0x65a   :  { %1585 = vpow2.f32 %v1435_v28  ;;  %v1002_v28 = vunpack.c.l.bf16 %v999_v15 }
 0x65b   :  { %1587 = vtanh.f32 %v969_v29 }
 0x662   :  { %v1582_v31 = vpop.eup %1581 }
 0x663   :  { %v1584_v32 = vpop.eup %1583  ;;  %v974_v34 = vadd.f32 1.0, %v1582_v31 }
 0x664   :  { %v980_v41 = vadd.f32 1.0, %v1584_v32  ;;  %v1586_v42 = vpop.eup %1585 }
 0x665   :  { %1589 = vrcp.f32 %v974_v34  ;;  %v1588_v43 = vpop.eup %1587  ;;  %v987_v48 = vadd.f32 1.0, %v1586_v42 }
 0x666   :  { %1591 = vrcp.f32 %v980_v41 }
 0x667   :  { %1593 = vrcp.f32 %v987_v48 }
 0x66f   :  { %v1590_v44 = vpop.eup %1589 }
 0x670   :  { %v1592_v45 = vpop.eup %1591  ;;  %v991_v46 = vmul.f32 %v1590_v44, %v1588_v43 }
 0x671   :  { %v990_v49 = vmul.f32 %v1592_v45, %v2239_v35  ;;  %v1594_v51 = vpop.eup %1593  ;;  %v1648_v35 = vld [vmem:[#allocation11 + $0x88] ss:$16 sps:$4 sm:$0xff]  }
 0x673   :  { %v2284_v50 = vadd.f32 %v991_v46, %v990_v49 }
 0x675   :  { %1595 = vtanh.f32 %v2284_v50 }
 0x67f   :  { %v1596_v52 = vpop.eup %1595 }
 0x680   :  { %v994_v1 = vmul.f32 %v1596_v52, %v1594_v51 }
 0x682   :  { %v1259_v6 = vmul.f32 %v2084_v40, %v994_v1  ;;  %v1004_v37 = vpack.c.bf16 %v994_v1, %v994_v1 }
 0x684   :  { %1272 = vadd.xlane.f32.xlu1 %v1259_v6  ;;  %1038 = vmatmul.mubr.bf16.vlgmr.msra.gmra.mrb[24].mxu0 %v1004_v37 }
 0x685   :  { %1079 = vmatmul.mubr.bf16.vlgmr.msra.gmra.mrb[24].mxu1 %v1004_v37  ;;  %1126 = vmatpush1.bf16.msra.mxu0 %v2243_v5  ;;  %v1654_v5 = vld [vmem:[#allocation11 + $0xcc] ss:$16 sps:$4 sm:$0xff]  }
 0x686   :  { %1167 = vmatpush1.bf16.msra.mxu1 %v1635_v53  ;;  %1127 = vmatprep.subr.bf16.mxu0 %v2247_v63  ;;  %v1655_v63 = vld [vmem:[#allocation11 + $0xc0] ss:$16 sps:$4 sm:$0xff]  }
 0x687   :  { %1168 = vmatprep.subr.bf16.mxu1 %v1636_v54  ;;  %1157 = vmatprep.mubr.bf16.mxu0 %v1832_v0 }
 0x688   :  { %1198 = vmatprep.mubr.bf16.mxu1 %v1832_v0  ;;  %v1645_v0 = vld [vmem:[#allocation11 + $0x84] ss:$16 sps:$4 sm:$0xff]  }
 0x689   :  { %1128 = vmatpush1.bf16.msra.mxu0 %v2253_v55  ;;  %v1656_v55 = vld [vmem:[#allocation11 + $0xc8] ss:$16 sps:$4 sm:$0xff]  }
 0x68a   :  { %1169 = vmatpush1.bf16.msra.mxu1 %v1637_v56  ;;  %1129 = vmatprep.subr.bf16.mxu0 %v2257_v39  ;;  %v1657_v39 = vld [vmem:[#allocation11 + $0xe4] ss:$16 sps:$4 sm:$0xff]  }
 0x68b   :  { %1170 = vmatprep.subr.bf16.mxu1 %v1638_v57  ;;  %v1118_v56 = vld [vmem:[#allocation5 + $0x70] sm:$0xff] }
 0x68c   :  { %v1120_v57 = vunpack.c.l.bf16 %v1118_v56 }
 0x68d   :  { %1130 = vmatpush1.bf16.msra.mxu0 %v1639_v58  ;;  %v1121_v58 = vunpack.c.h.bf16 %v1118_v56 }
 0x68e   :  { %1171 = vmatpush1.bf16.msra.mxu1 %v1640_v59  ;;  %1131 = vmatprep.subr.bf16.mxu0 %v1641_v60 }
 0x68f   :  { %1172 = vmatprep.subr.bf16.mxu1 %v1642_v47  ;;  %v1119_v47 = vld [vmem:[#allocation5 + $0x78] sm:$0xff] }
 0x691   :  { %1132 = vmatpush1.bf16.msra.mxu0 %v1643_v61 }
 0x692   :  { %1173 = vmatpush1.bf16.msra.mxu1 %v1644_v62  ;;  %1133 = vmatprep.subr.bf16.mxu0 %v1645_v0 }
 0x693   :  { %1174 = vmatprep.subr.bf16.mxu1 %v1646_v30 }
 0x695   :  { %1134 = vmatpush1.bf16.msra.mxu0 %v1647_v33 }
 0x696   :  { %1175 = vmatpush1.bf16.msra.mxu1 %v1648_v35  ;;  %1135 = vmatprep.subr.bf16.mxu0 %v1649_v36 }
 0x697   :  { %1176 = vmatprep.subr.bf16.mxu1 %v1650_v38 }
 0x699   :  { %1136 = vmatpush1.bf16.msra.mxu0 %v1651_v2 }
 0x69a   :  { %1177 = vmatpush1.bf16.msra.mxu1 %v1652_v3  ;;  %1137 = vmatprep.subr.bf16.mxu0 %v1653_v4  ;;  %v1122_v4 = vunpack.c.l.bf16 %v1119_v47 }
 0x69b   :  { %1178 = vmatprep.subr.bf16.mxu1 %v1654_v5 }
 0x69d   :  { %1138 = vmatpush1.bf16.msra.mxu0 %v1655_v63 }
 0x69e   :  { %1179 = vmatpush1.bf16.msra.mxu1 %v1656_v55  ;;  %1139 = vmatprep.subr.bf16.mxu0 %v1657_v39 }
 0x69f   :  { %1180 = vmatprep.subr.bf16.mxu1 %v1658_v7 }
 0x6a1   :  { %1140 = vmatpush1.bf16.msra.mxu0 %v1659_v8 }
 0x6a2   :  { %1181 = vmatpush1.bf16.msra.mxu1 %v1660_v9 }
 0x757   :  { %v1039_v13 = vpop.f32.mrb[24].mxu0 }
 0x758   :  { %v1087_v14 = vadd.f32 %v1039_v13, %v1000_v11  ;;  %v1080_v16 = vpop.f32.mrb[24].mxu1  ;;  %v1041_v17 = vpop.f32.mrb[25].mxu0 }
 0x759   :  { %v1088_v18 = vadd.f32 %v1041_v17, %v1001_v12  ;;  %v1082_v19 = vpop.f32.mrb[25].mxu1  ;;  %v1043_v20 = vpop.f32.mrb[26].mxu0  ;;  %v1089_v31 = vadd.f32 %v1080_v16, %v1002_v28 }
 0x75a   :  { %v1436_v21 = vmul.f32 -1.442695, %v1087_v14  ;;  %v1084_v22 = vpop.f32.mrb[26].mxu1  ;;  %v1044_v23 = vpop.f32.mrb[27].mxu0  ;;  %v1090_v27 = vadd.f32 %v1082_v19, %v1003_v25  ;;  %v1661_v20 = vld [vmem:[%s2339_s4] ss:$0 sm:$0xff] }
 0x75b   :  { %v1437_v24 = vmul.f32 -1.442695, %v1088_v18  ;;  %v1085_v26 = vpop.f32.mrb[27].mxu1 }
 0x75c   :  { %1597 = vpow2.f32 %v1436_v21  ;;  %v1438_v29 = vmul.f32 -1.442695, %v1090_v27 }
 0x75d   :  { %1599 = vpow2.f32 %v1437_v24 }
 0x75e   :  { %1601 = vpow2.f32 %v1438_v29 }
 0x75f   :  { %1603 = vtanh.f32 %v1089_v31 }
 0x766   :  { %v1598_v32 = vpop.eup %1597 }
 0x767   :  { %v1600_v34 = vpop.eup %1599  ;;  %v1094_v41 = vadd.f32 1.0, %v1598_v32 }
 0x768   :  { %v1100_v42 = vadd.f32 1.0, %v1600_v34  ;;  %v1602_v43 = vpop.eup %1601 }
 0x769   :  { %1605 = vrcp.f32 %v1094_v41  ;;  %v1604_v44 = vpop.eup %1603  ;;  %v1107_v49 = vadd.f32 1.0, %v1602_v43 }
 0x76a   :  { %1607 = vrcp.f32 %v1100_v42 }
 0x76b   :  { %1609 = vrcp.f32 %v1107_v49 }
 0x773   :  { %v1606_v45 = vpop.eup %1605 }
 0x774   :  { %v1608_v46 = vpop.eup %1607  ;;  %v1111_v48 = vmul.f32 %v1606_v45, %v1604_v44 }
 0x775   :  { %v1110_v51 = vmul.f32 %v1608_v46, %v2284_v50  ;;  %v1610_v1 = vpop.eup %1609 }
 0x777   :  { %v1112_v52 = vadd.f32 %v1111_v48, %v1110_v51 }
 0x779   :  { %1611 = vtanh.f32 %v1112_v52 }
 0x783   :  { %v1612_v6 = vpop.eup %1611 }
 0x784   :  { %v1114_v37 = vmul.f32 %v1612_v6, %v1610_v1 }
 0x786   :  { %v1260_v53 = vmul.f32 %v2084_v40, %v1114_v37  ;;  %v1124_v54 = vpack.c.bf16 %v1114_v37, %v1114_v37  ;;  %v1123_v40 = vunpack.c.h.bf16 %v1119_v47 }
 0x788   :  { %1274 = vadd.xlane.f32.xlu0 %v1260_v53  ;;  %1158 = vmatmul.mubr.bf16.vlgmr.msra.gmra.mrb[28].mxu0 %v1124_v54 }
 0x789   :  { %1199 = vmatmul.mubr.bf16.vlgmr.msra.gmra.mrb[28].mxu1 %v1124_v54 }
 0x85b   :  { %v1159_v59 = vpop.f32.mrb[28].mxu0 }
 0x85c   :  { %v1207_v60 = vadd.f32 %v1159_v59, %v1120_v57  ;;  %v1200_v61 = vpop.f32.mrb[28].mxu1  ;;  %v1161_v50 = vpop.f32.mrb[29].mxu0 }
 0x85d   :  { %v1208_v62 = vadd.f32 %v1161_v50, %v1121_v58  ;;  %v1202_v0 = vpop.f32.mrb[29].mxu1  ;;  %v1163_v30 = vpop.f32.mrb[30].mxu0  ;;  %v1209_v63 = vadd.f32 %v1200_v61, %v1122_v4 }
 0x85e   :  { %v1439_v33 = vmul.f32 -1.442695, %v1207_v60  ;;  %v1204_v35 = vpop.f32.mrb[30].mxu1  ;;  %v1164_v36 = vpop.f32.mrb[31].mxu0  ;;  %v1210_v3 = vadd.f32 %v1202_v0, %v1123_v40 }
 0x85f   :  { %v1440_v38 = vmul.f32 -1.442695, %v1208_v62  ;;  %v1205_v2 = vpop.f32.mrb[31].mxu1 }
 0x860   :  { %1613 = vpow2.f32 %v1439_v33  ;;  %v1441_v5 = vmul.f32 -1.442695, %v1210_v3 }
 0x861   :  { %1615 = vpow2.f32 %v1440_v38 }
 0x862   :  { %1617 = vpow2.f32 %v1441_v5 }
 0x863   :  { %1619 = vtanh.f32 %v1209_v63 }
 0x86a   :  { %v1614_v55 = vpop.eup %1613 }
 0x86b   :  { %v1616_v39 = vpop.eup %1615  ;;  %v1214_v7 = vadd.f32 1.0, %v1614_v55 }
 0x86c   :  { %v1220_v8 = vadd.f32 1.0, %v1616_v39  ;;  %v1618_v9 = vpop.eup %1617 }
 0x86d   :  { %1621 = vrcp.f32 %v1214_v7  ;;  %v1620_v10 = vpop.eup %1619  ;;  %v1227_v14 = vadd.f32 1.0, %v1618_v9 }
 0x86e   :  { %1623 = vrcp.f32 %v1220_v8 }
 0x86f   :  { %1625 = vrcp.f32 %v1227_v14 }
 0x877   :  { %v1622_v11 = vpop.eup %1621 }
 0x878   :  { %v1624_v12 = vpop.eup %1623  ;;  %v1231_v13 = vmul.f32 %v1622_v11, %v1620_v10 }
 0x879   :  { %v1230_v15 = vmul.f32 %v1624_v12, %v1112_v52  ;;  %v1626_v17 = vpop.eup %1625 }
 0x87b   :  { %v1232_v16 = vadd.f32 %v1231_v13, %v1230_v15 }
 0x87d   :  { %1627 = vtanh.f32 %v1232_v16  ;;  %1341 = vst [vmem:[#allocation16] sm:$0xff] %v1232_v16 }
 0x887   :  { %v1628_v18 = vpop.eup %1627 }
 0x888   :  { %v1234_v19 = vmul.f32 %v1628_v18, %v1626_v17 }
 0x88a   :  { %v1261_v21 = vmul.f32 %v1661_v20, %v1234_v19  ;;  %1340 = vst [vmem:[#allocation14] sm:$0xff] %v1234_v19 }
 0x88c   :  { %1276 = vadd.xlane.f32.xlu1 %v1261_v21 }
 0x88d   :  { %1761 = shalt.err (!%p1758_p8)
}
 0x88e   :  { %s1762_s10 = scalar_lea.hbm %s2341_s6, 128 }
 0x88f   :  { %p1763_p9 = scmp.ne.s32.totalorder %s2341_s6, %s1762_s10  ;;  %p1766_p10 = scmp.lt.u32.totalorder %s1762_s10, %s2341_s6 }
 0x891   :  { %p1768_p11 = pnand %p1766_p10, %p1763_p9 }
 0x893   :  { %1771 = shalt.err (!%p1768_p11)
}
 0x894   :  { %1361 = dma.vmem_to_hbm [thread:$0]  %s1359_s29, 128, %s2341_s6, [#allocation15]  }
 0x895   :  { %s1834_s27 = smov [#allocation16]  }
 0x896   :  { %s1368_s15 = sshll.u32 %s1834_s27, 4  ;;  %s1369_s15 = int_to_ptr.vmem [resolvable:$true] %s1368_s15 }
 0x897   :  { %s1772_s16 = scalar_lea.vmem %s1369_s15, 128  ;;  %p1777_p13 = scmp.lt.s32.totalorder %s1369_s15, %s1369_s15 }
 0x898   :  { %p1773_p12 = scmp.ne.s32.totalorder %s1369_s15, %s1772_s16  ;;  %p1778_p0 = scmp.lt.s32.totalorder %s1772_s16, %s1772_s16 }
 0x89a   :  { %p1779_p1 = por %p1778_p0, %p1777_p13 }
 0x89c   :  { %p1780_p2 = pnand %p1779_p1, %p1773_p12 }
 0x89e   :  { %1783 = shalt.err (!%p1780_p2)
}
 0x89f   :  { %s1784_s19 = scalar_lea.hbm %s2342_s7, 128 }
 0x8a0   :  { %p1785_p3 = scmp.ne.s32.totalorder %s2342_s7, %s1784_s19  ;;  %p1788_p4 = scmp.lt.u32.totalorder %s1784_s19, %s2342_s7 }
 0x8a2   :  { %p1790_p5 = pnand %p1788_p4, %p1785_p3 }
 0x8a4   :  { %1793 = shalt.err (!%p1790_p5)
}
 0x8a5   :  { %1371 = dma.vmem_to_hbm [thread:$0]  %s1369_s15, 128, %s2342_s7, [#allocation15]   ;;  %v1286_v22 = vlaneseq  ;;  %v1263_v23 = vpop.xlane.xlu0 %1262  ;;  %v1267_v24 = vpop.xlane.xlu1 %1266  ;;  %vm1320_vm0 = vcmask 1041409   ;;  %vm1322_vm1 = vcmask 1042434   ;;  %vm1324_vm2 = vcmask 1043459  }
 0x8a6   :  { %vm1326_vm3 = vcmask 1044484   ;;  %vm1328_vm4 = vcmask 1045509   ;;  %vm1330_vm5 = vcmask 1046534   ;;  %s1835_s7 = smov [#allocation13]   ;;  %vm1332_vm6 = vcmask 1047559  }
 0x8a7   :  { %v1287_v25 = vand.u32 127, %v1286_v22  ;;  %v1289_v26 = vshrl.u32 %v1286_v22, 7  ;;  %s1348_s25 = sshll.u32 %s1835_s7, 4  ;;  %vm1335_vm7 = vcmask 64512   ;;  %s1349_s25 = int_to_ptr.vmem [resolvable:$true] %s1348_s25 }
 0x8a8   :  { %s1794_s3 = scalar_lea.vmem %s1349_s25, 128  ;;  %p1799_p7 = scmp.lt.s32.totalorder %s1349_s25, %s1349_s25 }
 0x8a9   :  { %v1265_v27 = vpop.xlane.xlu0 %1264  ;;  %v1269_v28 = vpop.xlane.xlu1 %1268  ;;  %v1290_v29 = vsub.s32 %v1287_v25, %v1289_v26  ;;  %p1795_p6 = scmp.ne.s32.totalorder %s1349_s25, %s1794_s3  ;;  %p1800_p8 = scmp.lt.s32.totalorder %s1794_s3, %s1794_s3 }
 0x8ab   :  { %v1295_v32 = vrot.slane %v1265_v27, %v1290_v29  ;;  %v1299_v34 = vrot.slane %v1267_v24, %v1290_v29  ;;  %v1291_v42 = vrot.slane %v1263_v23, %v1290_v29  ;;  %v1303_v43 = vrot.slane %v1269_v28, %v1290_v29  ;;  %p1801_p9 = por %p1800_p8, %p1799_p7 }
 0x8ad   :  { %v1271_v31 = vpop.xlane.xlu0 %1270  ;;  %v1273_v41 = vpop.xlane.xlu1 %1272  ;;  %v1321_v46 = vsel %vm1320_vm0, %v1295_v32, %v1291_v42  ;;  %p1802_p10 = pnand %p1801_p9, %p1795_p6 }
 0x8ae   :  { %v1307_v45 = vrot.slane %v1271_v31, %v1290_v29  ;;  %v1311_v48 = vrot.slane %v1273_v41, %v1290_v29  ;;  %v1323_v49 = vsel %vm1322_vm1, %v1299_v34, %v1321_v46 }
 0x8af   :  { %v1325_v52 = vsel %vm1324_vm2, %v1303_v43, %v1323_v49 }
 0x8b0   :  { %v1327_v1 = vsel %vm1326_vm3, %v1307_v45, %v1325_v52 }
 0x8b1   :  { %v1275_v44 = vpop.xlane.xlu0 %1274  ;;  %v1329_v37 = vsel %vm1328_vm4, %v1311_v48, %v1327_v1 }
 0x8b2   :  { %v1315_v51 = vrot.slane %v1275_v44, %v1290_v29 }
 0x8b4   :  { %v1331_v54 = vsel %vm1330_vm5, %v1315_v51, %v1329_v37 }
 0x919   :  { %v1277_v6 = vpop.xlane.xlu1 %1276 }
 0x91a   :  { %v1319_v53 = vrot.slane %v1277_v6, %v1290_v29 }
 0x91c   :  { %v1333_v56 = vsel %vm1332_vm6, %v1319_v53, %v1331_v54 }
 0x91d   :  { %1336 = vst.msk [vmem:[#allocation13] sm:$0xff] %vm1335_vm7, %v1333_v56 }
 0x91e   :  { %1805 = shalt.err (!%p1802_p10)
}
 0x91f   :  { %s1806_s26 = scalar_lea.hbm %s2340_s5, 128 }
 0x920   :  { %p1807_p11 = scmp.ne.s32.totalorder %s2340_s5, %s1806_s26  ;;  %p1810_p12 = scmp.lt.u32.totalorder %s1806_s26, %s2340_s5 }
 0x922   :  { %p1812_p13 = pnand %p1810_p12, %p1807_p11 }
 0x924   :  { %1815 = shalt.err (!%p1812_p13)
}
 0x925   :  { %1351 = dma.vmem_to_hbm [thread:$0]  %s1349_s25, 128, %s2340_s5, [#allocation7]  }
 0x926   :  { %1822 = dma.done.wait [#allocation7], 128  }
 0x927   :  { %1823 = vsyncadd [#allocation7], 4294967168 }
 0x928   :  { %1824 = dma.done.wait [#allocation15], 256  }
 0x929   :  { %1825 = vsyncadd [#allocation15], 4294967040 }
 0x92a   :  { %1381 = vsyncpa [#allocation6], 1 }
 0x92b   :  { %1382 = vsyncpa [#allocation9], 1 }
 0x92c   :  { %1383 = vsyncpa [#allocation12], 1 }
 0x92d   :  { %1384 = vsyncpa [#allocation7], 1 }
 0x92e   :  { %1385 = vsyncpa [#allocation15], 1 }

</bundles_post_ra>
